<compile_context>
chip_gen: v6e
topology: v6e:2x2x1
jax: 0.10.0
libtpu: 0.0.40
codegen_flags: <defaults>
</compile_context>

<pallas_src>
import functools

import jax
import jax.numpy as jnp
from jax import lax
from jax.experimental import pallas as pl
from jax.experimental.pallas import tpu as pltpu

# Problem dimensions (param.dimx / param.dimua / param.dimub).
DIMX = 4
DIMUA = 4
DIMUB = 2
HIDDEN = 25

# Default batch tile: multiple of 512 (covers the 256-wide v6e/v7x MXU tile and
# the 128-wide v5e MXU / lane width).  At 4096 the per-call VMEM footprint is
# ~10 MiB (the (tile_b, 4) x/a blocks pad to 128 lanes in VMEM), comfortably
# inside even v5e's 16 MiB default scoped-VMEM window, while each grid step
# carries thousands of cycles of work vs. the ~600-cycle step overhead.
TILE_B = 4096

# Contract the last dim of both operands: W(out, k) x Y(tile_b, k) -> (out, tile_b).
# This is the "trans_b" matmul; the implied transpose of the batch tile lands on
# the XLU (idle here) and overlaps with MXU pushes — no wrapper-side transpose.
_TRANS_B = (((1,), (1,)), ((), ()))


def _cdiv(a: int, b: int) -> int:
    return -(-a // b)


def _round_up(n: int, m: int) -> int:
    return ((n + m - 1) // m) * m


def brnet_kernel(x_ref, a_ref, w1_ref, w2_ref, w3_ref, b_ref, o_ref, *, dimx, dimub):
    """One batch tile, batch-on-lanes.

    x_ref : (tile_b, dimx)   natural input layout (batch on sublanes)
    a_ref : (tile_b, dimua)
    w*_ref: torch-layout (out, in) weights (f32, or bf16 fast path)
    b_ref : (hidden, 3) packed bias columns [b1 | b2 | b3 zero-padded]  (f32)
    o_ref : (dimub, tile_b)  batch on lanes
    """
    cdt = w1_ref.dtype  # matmul operand dtype

    # Layer 1: W1 @ [x; a]^T as two rhs-transposed dots (transpose folded into the dot).
    h = lax.dot_general(w1_ref[:, :dimx], x_ref[...].astype(cdt), _TRANS_B,
                        preferred_element_type=jnp.float32)
    h = h + lax.dot_general(w1_ref[:, dimx:], a_ref[...].astype(cdt), _TRANS_B,
                            preferred_element_type=jnp.float32)
    h = jnp.maximum(h + b_ref[:, 0:1], 0.0)            # bias + ReLU in f32 (VPU)

    # Layer 2.
    h = jnp.dot(w2_ref[...], h.astype(cdt), preferred_element_type=jnp.float32)
    h = jnp.maximum(h + b_ref[:, 1:2], 0.0)

    # Layer 3.
    out = jnp.dot(w3_ref[...], h.astype(cdt), preferred_element_type=jnp.float32)
    out = out + b_ref[:dimub, 2:3]
    o_ref[...] = out.astype(o_ref.dtype)


def init_brnet_params(key, dimx=DIMX, dimua=DIMUA, dimub=DIMUB, hidden=HIDDEN,
                      dtype=jnp.float32):
    """Deterministic N(0, 0.1) init, mirroring the PyTorch __init__ (shapes only)."""
    ks = jax.random.split(key, 6)
    std = 0.1
    w1 = std * jax.random.normal(ks[0], (hidden, dimx + dimua), dtype)  # torch (out, in)
    b1 = std * jax.random.normal(ks[1], (hidden,), dtype)
    w2 = std * jax.random.normal(ks[2], (hidden, hidden), dtype)
    b2 = std * jax.random.normal(ks[3], (hidden,), dtype)
    w3 = std * jax.random.normal(ks[4], (dimub, hidden), dtype)
    b3 = std * jax.random.normal(ks[5], (dimub,), dtype)
    return dict(w1=w1, b1=b1, w2=w2, b2=b2, w3=w3, b3=b3)


def prepare_params(params, compute_dtype=jnp.float32):
    """One-time layout glue, hoisted out of the per-call path.

    Weights stay in torch (out, in) layout (the kernel computes W @ y^T); the
    three biases are packed into a single (hidden, 3) column operand.
    compute_dtype=jnp.bfloat16 enables the bf16-operand / f32-accumulate path.
    """
    hidden = params["w1"].shape[0]
    dimub = params["w3"].shape[0]
    b_packed = jnp.zeros((hidden, 3), jnp.float32)
    b_packed = b_packed.at[:, 0].set(params["b1"].astype(jnp.float32))
    b_packed = b_packed.at[:, 1].set(params["b2"].astype(jnp.float32))
    b_packed = b_packed.at[:dimub, 2].set(params["b3"].astype(jnp.float32))
    return dict(
        w1=params["w1"].astype(compute_dtype),
        w2=params["w2"].astype(compute_dtype),
        w3=params["w3"].astype(compute_dtype),
        b=b_packed,
    )


@functools.partial(jax.jit, static_argnames=("tile_b",))
def brnet_forward(x, a, prepped, tile_b=TILE_B):
    """Forward pass. Handles the 1-D case like torch.cat(dim=0) (unbatched)."""
    squeeze = x.ndim == 1
    if squeeze:
        x = x[None, :]
        a = a[None, :]

    B, dimx = x.shape
    dimua = a.shape[1]
    hidden, feat_in = prepped["w1"].shape
    dimub = prepped["w3"].shape[0]
    assert feat_in == dimx + dimua, "param/input feature mismatch"

    if B < 512:
        # Tiny / unbatched inputs: pad the batch to one lane-aligned tile
        # (negligible data) so blocks equal the full arrays and stay lane-dense.
        tile_b = min(_round_up(B, 128), 512)
        b_pad = tile_b
    else:
        # Big tiles amortize per-grid-step overhead; the cdiv(B, 2) clamp keeps
        # >= 2 tiles so the "parallel" axis can shard across v7x's 2 TensorCores.
        # Non-divisible batches become partial edge blocks (no wrapper pad).
        tile_b = min(tile_b, _round_up(_cdiv(B, 2), 512))
        b_pad = B

    if b_pad != B:
        x = jnp.pad(x, ((0, b_pad - B), (0, 0)))
        a = jnp.pad(a, ((0, b_pad - B), (0, 0)))
    num_tiles = _cdiv(b_pad, tile_b)

    def _const(arr):  # VMEM-resident operand: same block every grid step
        return pl.BlockSpec(arr.shape, lambda i: (0, 0))

    cp_kwargs = dict(dimension_semantics=("parallel",))
    if tile_b > 4096:
        # Larger tiles can brush against v5e's 16 MiB default scoped-VMEM window
        # (the (tile_b, 4) x/a blocks pad to 128 lanes in VMEM).
        cp_kwargs["vmem_limit_bytes"] = 64 * 1024 * 1024

    out_t = pl.pallas_call(
        functools.partial(brnet_kernel, dimx=dimx, dimub=dimub),
        out_shape=jax.ShapeDtypeStruct((dimub, b_pad), x.dtype),
        grid=(num_tiles,),
        in_specs=[
            pl.BlockSpec((tile_b, dimx), lambda i: (i, 0)),    # x batch tile
            pl.BlockSpec((tile_b, dimua), lambda i: (i, 0)),   # a batch tile
            _const(prepped["w1"]),                             # W1 (25, 8)
            _const(prepped["w2"]),                             # W2 (25, 25)
            _const(prepped["w3"]),                             # W3 (2, 25)
            _const(prepped["b"]),                              # packed biases (25, 3)
        ],
        out_specs=pl.BlockSpec((dimub, tile_b), lambda i: (0, i)),
        compiler_params=pltpu.CompilerParams(**cp_kwargs),
    )(x, a, prepped["w1"], prepped["w2"], prepped["w3"], prepped["b"])

    out = out_t[:, :B].T                    # back to (B, dimub); 8 B/sample
    if squeeze:
        out = out[0]
    return out


def _reference_forward(x, a, p):
    """Pure-jnp reference of the torch forward (for correctness check)."""
    y = jnp.concatenate([x, a], axis=-1)
    y = jnp.maximum(y @ p["w1"].T + p["b1"], 0.0)
    y = jnp.maximum(y @ p["w2"].T + p["b2"], 0.0)
    return y @ p["w3"].T + p["b3"]


if __name__ == "__main__":
    key = jax.random.PRNGKey(0)
    kp, kx, ka = jax.random.split(key, 3)

    params = init_brnet_params(kp)

    # Batched case: exercises 2 grid tiles (v7x-shardable) plus a partial edge block.
    batch = 3000
    x = jax.random.normal(kx, (batch, DIMX), jnp.float32)
    a = jax.random.normal(ka, (batch, DIMUA), jnp.float32)
    ref = _reference_forward(x, a, params)

    # f32 path (semantics-preserving within TPU limits).
    prepped = prepare_params(params, compute_dtype=jnp.float32)
    out = jax.block_until_ready(brnet_forward(x, a, prepped))
    assert out.shape == (batch, DIMUB)
    assert jnp.allclose(out, ref, atol=1e-5, rtol=1e-5)

    # Unbatched (1-D) case, matching the torch.cat(dim=0) path.
    out1 = jax.block_until_ready(brnet_forward(x[0], a[0], prepped))
    assert out1.shape == (DIMUB,)
    assert jnp.allclose(out1, ref[0], atol=1e-5, rtol=1e-5)

    # bf16-operand / f32-accumulate fast path (per perf review); looser tolerance.
    prepped_bf16 = prepare_params(params, compute_dtype=jnp.bfloat16)
    out_bf16 = jax.block_until_ready(brnet_forward(x, a, prepped_bf16))
    assert out_bf16.shape == (batch, DIMUB)
    assert jnp.allclose(out_bf16, ref, atol=5e-2, rtol=5e-2)

    print("KERNEL_OK")
</pallas_src>

<mosaic_0001>
module attributes {stable_mosaic.version = 11 : i64} {
  func.func @brnet_kernel(%arg0: i32, %arg1: memref<1536x4xf32, #tpu.memory_space<vmem>>, %arg2: memref<1536x4xf32, #tpu.memory_space<vmem>>, %arg3: memref<25x8xf32, #tpu.memory_space<vmem>>, %arg4: memref<25x25xf32, #tpu.memory_space<vmem>>, %arg5: memref<2x25xf32, #tpu.memory_space<vmem>>, %arg6: memref<25x3xf32, #tpu.memory_space<vmem>>, %arg7: memref<2x1536xf32, #tpu.memory_space<vmem>>) attributes {dimension_semantics = [#tpu.dimension_semantics<parallel>], iteration_bounds = array<i64: 2>, scalar_prefetch = 0 : i64, scratch_operands = 0 : i64, tpu.core_type = #tpu.core_type<tc>, window_params = [{transform_indices = @transform_0, window_bounds = array<i64: 1536, 4>}, {transform_indices = @transform_1, window_bounds = array<i64: 1536, 4>}, {pipeline_mode = #tpu.pipeline_mode<synchronous>, transform_indices = @transform_2, window_bounds = array<i64: 25, 8>}, {pipeline_mode = #tpu.pipeline_mode<synchronous>, transform_indices = @transform_3, window_bounds = array<i64: 25, 25>}, {pipeline_mode = #tpu.pipeline_mode<synchronous>, transform_indices = @transform_4, window_bounds = array<i64: 2, 25>}, {pipeline_mode = #tpu.pipeline_mode<synchronous>, transform_indices = @transform_5, window_bounds = array<i64: 25, 3>}, {transform_indices = @transform_6, window_bounds = array<i64: 2, 1536>}]} {
    %c0 = arith.constant 0 : index
    %c0_0 = arith.constant 0 : index
    %0 = vector.load %arg3[%c0, %c0_0] : memref<25x8xf32, #tpu.memory_space<vmem>>, vector<25x4xf32>
    %c0_1 = arith.constant 0 : index
    %c0_2 = arith.constant 0 : index
    %1 = vector.load %arg1[%c0_1, %c0_2] : memref<1536x4xf32, #tpu.memory_space<vmem>>, vector<1536x4xf32>
    %cst = arith.constant dense<0.000000e+00> : vector<25x1536xf32>
    %2 = tpu.matmul %0, %1, %cst {dimension_numbers = #tpu.dot_dimension_numbers<[1], [1], [0], [0], [0, 0, 1, 0], [], []>} : vector<25x4xf32>, vector<1536x4xf32>, vector<25x1536xf32> -> vector<25x1536xf32>
    %c0_3 = arith.constant 0 : index
    %c4 = arith.constant 4 : index
    %3 = vector.load %arg3[%c0_3, %c4] : memref<25x8xf32, #tpu.memory_space<vmem>>, vector<25x4xf32>
    %c0_4 = arith.constant 0 : index
    %c0_5 = arith.constant 0 : index
    %4 = vector.load %arg2[%c0_4, %c0_5] : memref<1536x4xf32, #tpu.memory_space<vmem>>, vector<1536x4xf32>
    %cst_6 = arith.constant dense<0.000000e+00> : vector<25x1536xf32>
    %5 = tpu.matmul %3, %4, %cst_6 {dimension_numbers = #tpu.dot_dimension_numbers<[1], [1], [0], [0], [0, 0, 1, 0], [], []>} : vector<25x4xf32>, vector<1536x4xf32>, vector<25x1536xf32> -> vector<25x1536xf32>
    %6 = arith.addf %2, %5 : vector<25x1536xf32>
    %c0_7 = arith.constant 0 : index
    %c0_8 = arith.constant 0 : index
    %7 = vector.load %arg6[%c0_7, %c0_8] : memref<25x3xf32, #tpu.memory_space<vmem>>, vector<25x1xf32>
    %8 = vector.broadcast %7 : vector<25x1xf32> to vector<25x1536xf32>
    %9 = arith.addf %6, %8 : vector<25x1536xf32>
    %cst_9 = arith.constant 0.000000e+00 : f32
    %10 = vector.broadcast %cst_9 : f32 to vector<25x1536xf32>
    %11 = arith.maximumf %9, %10 : vector<25x1536xf32>
    %c0_10 = arith.constant 0 : index
    %c0_11 = arith.constant 0 : index
    %12 = vector.load %arg4[%c0_10, %c0_11] : memref<25x25xf32, #tpu.memory_space<vmem>>, vector<25x25xf32>
    %cst_12 = arith.constant dense<0.000000e+00> : vector<25x1536xf32>
    %13 = tpu.matmul %12, %11, %cst_12 {dimension_numbers = #tpu.dot_dimension_numbers<[1], [0], [0], [1], [0, 0, 1, 1], [], []>} : vector<25x25xf32>, vector<25x1536xf32>, vector<25x1536xf32> -> vector<25x1536xf32>
    %c0_13 = arith.constant 0 : index
    %c1 = arith.constant 1 : index
    %14 = vector.load %arg6[%c0_13, %c1] : memref<25x3xf32, #tpu.memory_space<vmem>>, vector<25x1xf32>
    %15 = vector.broadcast %14 : vector<25x1xf32> to vector<25x1536xf32>
    %16 = arith.addf %13, %15 : vector<25x1536xf32>
    %cst_14 = arith.constant 0.000000e+00 : f32
    %17 = vector.broadcast %cst_14 : f32 to vector<25x1536xf32>
    %18 = arith.maximumf %16, %17 : vector<25x1536xf32>
    %c0_15 = arith.constant 0 : index
    %c0_16 = arith.constant 0 : index
    %19 = vector.load %arg5[%c0_15, %c0_16] : memref<2x25xf32, #tpu.memory_space<vmem>>, vector<2x25xf32>
    %cst_17 = arith.constant dense<0.000000e+00> : vector<2x1536xf32>
    %20 = tpu.matmul %19, %18, %cst_17 {dimension_numbers = #tpu.dot_dimension_numbers<[1], [0], [0], [1], [0, 0, 1, 1], [], []>} : vector<2x25xf32>, vector<25x1536xf32>, vector<2x1536xf32> -> vector<2x1536xf32>
    %c0_18 = arith.constant 0 : index
    %c2 = arith.constant 2 : index
    %21 = vector.load %arg6[%c0_18, %c2] : memref<25x3xf32, #tpu.memory_space<vmem>>, vector<2x1xf32>
    %22 = vector.broadcast %21 : vector<2x1xf32> to vector<2x1536xf32>
    %23 = arith.addf %20, %22 : vector<2x1536xf32>
    %c0_19 = arith.constant 0 : index
    %c0_20 = arith.constant 0 : index
    %24 = vector.load %arg7[%c0_19, %c0_20] : memref<2x1536xf32, #tpu.memory_space<vmem>>, vector<2x1536xf32>
    tpu.vector_store %arg7[%c0_19, %c0_20], %23 {strides = array<i32>} : memref<2x1536xf32, #tpu.memory_space<vmem>>, vector<2x1536xf32>,
    return
  }
  func.func @transform_0(%arg0: i32) -> (i32, i32) {
    %c0_i32 = arith.constant 0 : i32
    %c0_i32_0 = arith.constant 0 : i32
    return %arg0, %c0_i32 : i32, i32
  }
  func.func @transform_1(%arg0: i32) -> (i32, i32) {
    %c0_i32 = arith.constant 0 : i32
    %c0_i32_0 = arith.constant 0 : i32
    return %arg0, %c0_i32 : i32, i32
  }
  func.func @transform_2(%arg0: i32) -> (i32, i32) {
    %c0_i32 = arith.constant 0 : i32
    %c0_i32_0 = arith.constant 0 : i32
    %c0_i32_1 = arith.constant 0 : i32
    return %c0_i32, %c0_i32_0 : i32, i32
  }
  func.func @transform_3(%arg0: i32) -> (i32, i32) {
    %c0_i32 = arith.constant 0 : i32
    %c0_i32_0 = arith.constant 0 : i32
    %c0_i32_1 = arith.constant 0 : i32
    return %c0_i32, %c0_i32_0 : i32, i32
  }
  func.func @transform_4(%arg0: i32) -> (i32, i32) {
    %c0_i32 = arith.constant 0 : i32
    %c0_i32_0 = arith.constant 0 : i32
    %c0_i32_1 = arith.constant 0 : i32
    return %c0_i32, %c0_i32_0 : i32, i32
  }
  func.func @transform_5(%arg0: i32) -> (i32, i32) {
    %c0_i32 = arith.constant 0 : i32
    %c0_i32_0 = arith.constant 0 : i32
    %c0_i32_1 = arith.constant 0 : i32
    return %c0_i32, %c0_i32_0 : i32, i32
  }
  func.func @transform_6(%arg0: i32) -> (i32, i32) {
    %c0_i32 = arith.constant 0 : i32
    %c0_i32_0 = arith.constant 0 : i32
    return %c0_i32, %arg0 : i32, i32
  }
}

</mosaic_0001>

<bundles_post_ra>
// kernel: brnet_forward.1
= control target key start
LH: loop header
LB: loop body
LE: loop exit
PB: predicated region body
PF: predicated region fallthrough
CT: control target
= control target key end

     0   :  { %11 = vsyncpa [#allocation3], 0  ;;  %s7025_s0 = inlined_call_operand.vmem [shape: f32[3000,4], index: 0, kind: input, shape index: {}]   ;;  %s7026_s1 = inlined_call_operand.vmem [shape: f32[3000,4], index: 1, kind: input, shape index: {}]   ;;  %s7027_s2 = inlined_call_operand.vmem [shape: f32[25,8], index: 2, kind: input, shape index: {}]   ;;  %s7028_s3 = inlined_call_operand.vmem [shape: f32[25,25], index: 3, kind: input, shape index: {}]   ;;  %s7029_s4 = inlined_call_operand.vmem [shape: f32[2,25], index: 4, kind: input, shape index: {}]   ;;  %s7030_s5 = inlined_call_operand.vmem [shape: f32[25,3], index: 5, kind: input, shape index: {}]   ;;  %s7031_s6 = inlined_call_operand.hbm [shape: f32[2,3000], index: 6, kind: output, shape index: {}]  }
   0x1   :  { %13 = vsyncpa [#allocation3 + $0x1], 0  ;;  %s5490_s21 = smov 0   ;;  %s5492_s22 = smov 0  }
   0x2   :  { %s5494_s23 = smov 0   ;;  %s5496_s24 = smov 0  }
   0x3 LB: > { %s5511_s25 = sadd.s32 4294967295, %s5446_s24   ;;  %s4351_s26 = sadd.s32 4294967294, %s5446_s24   ;;  %s5446_s24 = sphi %s5496_s24, %s7062_s24   ;;  %s5442_s23 = sphi %s5494_s23, %s7061_s23   ;;  %s5438_s22 = sphi %s5492_s22, %s7060_s22   ;;  %s5434_s21 = sphi %s5490_s21, %s7059_s21  }
   0x4   : > { %s5515_s27 = sadd.s32 1, %s5446_s24   ;;  %s162_s28 = sadd.s32 1, %s5442_s23 }
   0x5   : > { %s159_s29 = ssub.s32 %s5446_s24, %s5515_s27  ;;  %p172_p0 = scmp.ne.s32.totalorder %s5442_s23, %s5438_s22 }
   0x6   : > { %p160_p1 = scmp.eq.s32.totalorder %s159_s29, 0  ;;  %p173_p2 = scmp.eq.s32.totalorder %s5511_s25, 1 }
   0x7   : > { %p178_p3 = scmp.ne.s32.totalorder %s5438_s22, %s5434_s21  ;;  %p179_p4 = scmp.eq.s32.totalorder %s4351_s26, 1 }
   0x8   : > { %s5526_s30 = scalar_select %p160_p1, %s5442_s23, %s162_s28  }
   0x9   : > { %p5528_p5 = por %p173_p2, %p172_p0  ;;  %p5532_p6 = por %p179_p4, %p178_p3 }
   0xa   : > { %p4354_p7 = scmp.ge.s32.totalorder %s5446_s24, 1  ;;  %p243_p8 = scmp.lt.s32.totalorder %s5446_s24, 3 }
   0xc   : > { %p244_p9 = pnand %p4354_p7, %p243_p8 }
   0xe   : > { %247 = sbr.rel (%p244_p9) target bundleno = 1114 (0x45a), region = 44 }
  0x13   : > { %v5541_v0 = vld [vmem:[%s7027_s2] sm:$0xff]  ;;  %v317_v1 = vld [vmem:[%s7027_s2 + $0x10] sm:$0xff]  ;;  %s286_s13 = smul.u32 192, %s5511_s25  ;;  %s5448_s14 = smov 124   ;;  %v316_v2 = vld [vmem:[%s7027_s2 + $0x8] sm:$0xff]  ;;  %vm715_vm0 = vcmask 31744  }
  0x14   : > { %707 = vrot.lane.b32.xlu0 %v5541_v0, %s5448_s14  ;;  %711 = vrot.lane.b32.xlu1 %v317_v1, %s5448_s14  ;;  %v318_v3 = vld [vmem:[%s7027_s2 + $0x18] sm:$0x1]  ;;  %vm3105_vm1 = vcmask 1040384   ;;  %vm3092_vm2 = vcmask 203776   ;;  %s283_s17 = sand.u32 1, %s5438_s22   ;;  %s4846_s20 = smul.u32 384, %s5511_s25 }
  0x15   : > { %p291_p10 = scmp.lt.s32.totalorder %s286_s13, 374  ;;  %s5327_s18 = smul.u32 24, %s283_s17 }
  0x16   : > { %s4278_s9 = scalar_lea.hbm %s7031_s6, %s4846_s20  ;;  %s4266_s11 = scalar_lea.sflag [#allocation3], %s283_s17 }
  0x17   : > { %s7064_s13 = smov (!%p291_p10, %s286_s13), 374 }
  0x18   : > { %709 = vrot.lane.b32.xlu0 %v316_v2, %s5448_s14  ;;  %713 = vrot.lane.b32.xlu1 %v318_v3, %s5448_s14  ;;  %s4355_s19 = sshll.u32 %s7064_s13, 3 }
  0x19   : > { %s5562_s28 = scalar_lea.vmem %s7026_s1, %s4355_s19  ;;  %s6021_s10 = scalar_lea.vmem %s7025_s0, %s4355_s19 }
  0x1a   : > { %v542_v4 = vld [vmem:[%s5562_s28 + $0xf8] sm:$0xff]  ;;  %v541_v8 = vld [vmem:[%s5562_s28 + $0xf0] sm:$0xff]  ;;  %v540_v12 = vld [vmem:[%s5562_s28 + $0xe8] sm:$0xff]  ;;  %s6984_s19 = scalar_lea.vmem [#allocation2], %s5327_s18 }
  0x1b   : > { %v574_v5 = vld [vmem:[%s5562_s28 + $0x1f8] sm:$0xff]  ;;  %4847 = vmatprep.subr.msk.mxu0 %vm715_vm0, %v542_v4  ;;  %v573_v9 = vld [vmem:[%s5562_s28 + $0x1f0] sm:$0xff]  ;;  %v572_v13 = vld [vmem:[%s5562_s28 + $0x1e8] sm:$0xff]  ;;  %s4280_s26 = sshll.u32 %s6984_s19, 4  ;;  %s4281_s26 = int_to_ptr.vmem [resolvable:$true] %s4280_s26 }
  0x1c   : > { %v526_v6 = vld [vmem:[%s5562_s28 + $0x78] sm:$0xff]  ;;  %4887 = vmatprep.subr.msk.mxu1 %vm715_vm0, %v574_v5  ;;  %v525_v10 = vld [vmem:[%s5562_s28 + $0x70] sm:$0xff]  ;;  %v524_v14 = vld [vmem:[%s5562_s28 + $0x68] sm:$0xff]  ;;  %s5386_s12 = scalar_lea.vmem %s4281_s26, 384 }
  0x1d   : > { %v558_v7 = vld [vmem:[%s5562_s28 + $0x178] sm:$0xff]  ;;  %4848 = vmatpush3.xpose.msk.msra.mxu0 %vm715_vm0, %v526_v6  ;;  %v557_v11 = vld [vmem:[%s5562_s28 + $0x170] sm:$0xff]  ;;  %v556_v15 = vld [vmem:[%s5562_s28 + $0x168] sm:$0xff]  ;;  %p5387_p11 = scmp.ne.s32.totalorder %s4281_s26, %s5386_s12 }
  0x1e   : > { %4888 = vmatpush3.xpose.msk.msra.mxu1 %vm715_vm0, %v558_v7  ;;  %4849 = vmatprep.subr.msk.mxu0 %vm715_vm0, %v541_v8  ;;  %v539_v16 = vld [vmem:[%s5562_s28 + $0xe0] sm:$0xff]  ;;  %v538_v20 = vld [vmem:[%s5562_s28 + $0xd8] sm:$0xff]  ;;  %v537_v24 = vld [vmem:[%s5562_s28 + $0xd0] sm:$0xff] }
  0x1f   : > { %4889 = vmatprep.subr.msk.mxu1 %vm715_vm0, %v573_v9  ;;  %v571_v17 = vld [vmem:[%s5562_s28 + $0x1e0] sm:$0xff]  ;;  %v570_v21 = vld [vmem:[%s5562_s28 + $0x1d8] sm:$0xff]  ;;  %v569_v25 = vld [vmem:[%s5562_s28 + $0x1d0] sm:$0xff]  ;;  %p5388_p12 = pnand %p5387_p11, %p5528_p5 }
  0x20   : > { %v523_v18 = vld [vmem:[%s5562_s28 + $0x60] sm:$0xff]  ;;  %v522_v22 = vld [vmem:[%s5562_s28 + $0x58] sm:$0xff]  ;;  %v521_v26 = vld [vmem:[%s5562_s28 + $0x50] sm:$0xff] }
  0x21   : > { %4850 = vmatpush3.xpose.msk.msra.mxu0 %vm715_vm0, %v525_v10  ;;  %v555_v19 = vld [vmem:[%s5562_s28 + $0x160] sm:$0xff]  ;;  %v554_v23 = vld [vmem:[%s5562_s28 + $0x158] sm:$0xff]  ;;  %v553_v27 = vld [vmem:[%s5562_s28 + $0x150] sm:$0xff]  ;;  %p5389_p13 = pneg %p5388_p12 }
  0x22   : > { %4890 = vmatpush3.xpose.msk.msra.mxu1 %vm715_vm0, %v557_v11  ;;  %4851 = vmatprep.subr.msk.mxu0 %vm715_vm0, %v540_v12  ;;  %v536_v28 = vld [vmem:[%s5562_s28 + $0xc8] sm:$0xff]  ;;  %v535_v32 = vld [vmem:[%s5562_s28 + $0xc0] sm:$0xff]  ;;  %v534_v36 = vld [vmem:[%s5562_s28 + $0xb8] sm:$0xff] }
  0x23   : > { %4891 = vmatprep.subr.msk.mxu1 %vm715_vm0, %v572_v13  ;;  %v568_v29 = vld [vmem:[%s5562_s28 + $0x1c8] sm:$0xff]  ;;  %v567_v33 = vld [vmem:[%s5562_s28 + $0x1c0] sm:$0xff]  ;;  %v566_v37 = vld [vmem:[%s5562_s28 + $0x1b8] sm:$0xff] }
  0x24   : > { %v520_v30 = vld [vmem:[%s5562_s28 + $0x48] sm:$0xff]  ;;  %v519_v34 = vld [vmem:[%s5562_s28 + $0x40] sm:$0xff]  ;;  %v518_v38 = vld [vmem:[%s5562_s28 + $0x38] sm:$0xff] }
  0x25   : > { %4852 = vmatpush3.xpose.msk.msra.mxu0 %vm715_vm0, %v524_v14  ;;  %v552_v31 = vld [vmem:[%s5562_s28 + $0x148] sm:$0xff]  ;;  %v551_v35 = vld [vmem:[%s5562_s28 + $0x140] sm:$0xff]  ;;  %v550_v39 = vld [vmem:[%s5562_s28 + $0x138] sm:$0xff] }
  0x26   : > { %4892 = vmatpush3.xpose.msk.msra.mxu1 %vm715_vm0, %v556_v15  ;;  %4853 = vmatprep.subr.msk.mxu0 %vm715_vm0, %v539_v16  ;;  %v533_v40 = vld [vmem:[%s5562_s28 + $0xb0] sm:$0xff]  ;;  %v532_v44 = vld [vmem:[%s5562_s28 + $0xa8] sm:$0xff]  ;;  %v531_v48 = vld [vmem:[%s5562_s28 + $0xa0] sm:$0xff] }
  0x27   : > { %4893 = vmatprep.subr.msk.mxu1 %vm715_vm0, %v571_v17  ;;  %v565_v41 = vld [vmem:[%s5562_s28 + $0x1b0] sm:$0xff]  ;;  %v564_v45 = vld [vmem:[%s5562_s28 + $0x1a8] sm:$0xff]  ;;  %v563_v49 = vld [vmem:[%s5562_s28 + $0x1a0] sm:$0xff] }
  0x28   : > { %v517_v42 = vld [vmem:[%s5562_s28 + $0x30] sm:$0xff]  ;;  %v516_v46 = vld [vmem:[%s5562_s28 + $0x28] sm:$0xff]  ;;  %v515_v50 = vld [vmem:[%s5562_s28 + $0x20] sm:$0xff] }
  0x29   : > { %4854 = vmatpush3.xpose.msk.msra.mxu0 %vm715_vm0, %v523_v18  ;;  %v549_v43 = vld [vmem:[%s5562_s28 + $0x130] sm:$0xff]  ;;  %v548_v47 = vld [vmem:[%s5562_s28 + $0x128] sm:$0xff]  ;;  %v547_v51 = vld [vmem:[%s5562_s28 + $0x120] sm:$0xff] }
  0x2a   : > { %4894 = vmatpush3.xpose.msk.msra.mxu1 %vm715_vm0, %v555_v19  ;;  %4855 = vmatprep.subr.msk.mxu0 %vm715_vm0, %v538_v20  ;;  %v530_v52 = vld [vmem:[%s5562_s28 + $0x98] sm:$0xff]  ;;  %v529_v56 = vld [vmem:[%s5562_s28 + $0x90] sm:$0xff]  ;;  %v528_v60 = vld [vmem:[%s5562_s28 + $0x88] sm:$0xff] }
  0x2b   : > { %4895 = vmatprep.subr.msk.mxu1 %vm715_vm0, %v570_v21  ;;  %v562_v53 = vld [vmem:[%s5562_s28 + $0x198] sm:$0xff]  ;;  %v561_v57 = vld [vmem:[%s5562_s28 + $0x190] sm:$0xff]  ;;  %v560_v61 = vld [vmem:[%s5562_s28 + $0x188] sm:$0xff] }
  0x2c   : > { %v514_v54 = vld [vmem:[%s5562_s28 + $0x18] sm:$0xff]  ;;  %v513_v58 = vld [vmem:[%s5562_s28 + $0x10] sm:$0xff]  ;;  %v512_v62 = vld [vmem:[%s5562_s28 + $0x8] sm:$0xff] }
  0x2d   : > { %4856 = vmatpush3.xpose.msk.msra.mxu0 %vm715_vm0, %v522_v22  ;;  %v546_v55 = vld [vmem:[%s5562_s28 + $0x118] sm:$0xff]  ;;  %v545_v59 = vld [vmem:[%s5562_s28 + $0x110] sm:$0xff]  ;;  %v544_v63 = vld [vmem:[%s5562_s28 + $0x108] sm:$0xff] }
  0x2e   : > { %4896 = vmatpush3.xpose.msk.msra.mxu1 %vm715_vm0, %v554_v23  ;;  %4857 = vmatprep.subr.msk.mxu0 %vm715_vm0, %v537_v24  ;;  %v527_v1 = vld [vmem:[%s5562_s28 + $0x80] sm:$0xff]  ;;  %v606_v5 = vld [vmem:[%s5562_s28 + $0x2f8] sm:$0xff]  ;;  %v605_v10 = vld [vmem:[%s5562_s28 + $0x2f0] sm:$0xff] }
  0x2f   : > { %4897 = vmatprep.subr.msk.mxu1 %vm715_vm0, %v569_v25  ;;  %v559_v2 = vld [vmem:[%s5562_s28 + $0x180] sm:$0xff]  ;;  %v638_v6 = vld [vmem:[%s5562_s28 + $0x3f8] sm:$0xff]  ;;  %v637_v11 = vld [vmem:[%s5562_s28 + $0x3f0] sm:$0xff] }
  0x30   : > { %v511_v3 = vld [vmem:[%s5562_s28] sm:$0xff]  ;;  %v590_v8 = vld [vmem:[%s5562_s28 + $0x278] sm:$0xff]  ;;  %v589_v14 = vld [vmem:[%s5562_s28 + $0x270] sm:$0xff] }
  0x31   : > { %4858 = vmatpush3.xpose.msk.msra.mxu0 %vm715_vm0, %v521_v26  ;;  %v543_v4 = vld [vmem:[%s5562_s28 + $0x100] sm:$0xff]  ;;  %v622_v9 = vld [vmem:[%s5562_s28 + $0x378] sm:$0xff]  ;;  %v621_v15 = vld [vmem:[%s5562_s28 + $0x370] sm:$0xff] }
  0x32   : > { %4898 = vmatpush3.xpose.msk.msra.mxu1 %vm715_vm0, %v553_v27  ;;  %4859 = vmatprep.subr.msk.mxu0 %vm715_vm0, %v536_v28  ;;  %v604_v16 = vld [vmem:[%s5562_s28 + $0x2e8] sm:$0xff]  ;;  %v603_v21 = vld [vmem:[%s5562_s28 + $0x2e0] sm:$0xff]  ;;  %v602_v25 = vld [vmem:[%s5562_s28 + $0x2d8] sm:$0xff] }
  0x33   : > { %4899 = vmatprep.subr.msk.mxu1 %vm715_vm0, %v568_v29  ;;  %v636_v17 = vld [vmem:[%s5562_s28 + $0x3e8] sm:$0xff]  ;;  %v635_v22 = vld [vmem:[%s5562_s28 + $0x3e0] sm:$0xff]  ;;  %v634_v26 = vld [vmem:[%s5562_s28 + $0x3d8] sm:$0xff] }
  0x34   : > { %v588_v18 = vld [vmem:[%s5562_s28 + $0x268] sm:$0xff]  ;;  %v587_v23 = vld [vmem:[%s5562_s28 + $0x260] sm:$0xff]  ;;  %v586_v27 = vld [vmem:[%s5562_s28 + $0x258] sm:$0xff] }
  0x35   : > { %4860 = vmatpush3.xpose.msk.msra.mxu0 %vm715_vm0, %v520_v30  ;;  %v620_v19 = vld [vmem:[%s5562_s28 + $0x368] sm:$0xff]  ;;  %v619_v24 = vld [vmem:[%s5562_s28 + $0x360] sm:$0xff]  ;;  %v618_v28 = vld [vmem:[%s5562_s28 + $0x358] sm:$0xff] }
  0x36   : > { %4900 = vmatpush3.xpose.msk.msra.mxu1 %vm715_vm0, %v552_v31  ;;  %4861 = vmatprep.subr.msk.mxu0 %vm715_vm0, %v535_v32  ;;  %v601_v29 = vld [vmem:[%s5562_s28 + $0x2d0] sm:$0xff] }
  0x37   : > { %4901 = vmatprep.subr.msk.mxu1 %vm715_vm0, %v567_v33  ;;  %v633_v30 = vld [vmem:[%s5562_s28 + $0x3d0] sm:$0xff]  ;;  %v600_v33 = vld [vmem:[%s5562_s28 + $0x2c8] sm:$0xff] }
  0x38   : > { %v585_v31 = vld [vmem:[%s5562_s28 + $0x250] sm:$0xff] }
  0x39   : > { %4862 = vmatpush3.xpose.msk.msra.mxu0 %vm715_vm0, %v519_v34  ;;  %v617_v32 = vld [vmem:[%s5562_s28 + $0x350] sm:$0xff]  ;;  %v632_v34 = vld [vmem:[%s5562_s28 + $0x3c8] sm:$0xff] }
  0x3a   : > { %4902 = vmatpush3.xpose.msk.msra.mxu1 %vm715_vm0, %v551_v35  ;;  %4863 = vmatprep.subr.msk.mxu0 %vm715_vm0, %v534_v36  ;;  %v584_v35 = vld [vmem:[%s5562_s28 + $0x248] sm:$0xff] }
  0x3b   : > { %4903 = vmatprep.subr.msk.mxu1 %vm715_vm0, %v566_v37  ;;  %v616_v36 = vld [vmem:[%s5562_s28 + $0x348] sm:$0xff]  ;;  %v599_v37 = vld [vmem:[%s5562_s28 + $0x2c0] sm:$0xff] }
  0x3d   : > { %4864 = vmatpush3.xpose.msk.msra.mxu0 %vm715_vm0, %v518_v38  ;;  %v631_v38 = vld [vmem:[%s5562_s28 + $0x3c0] sm:$0xff] }
  0x3e   : > { %4904 = vmatpush3.xpose.msk.msra.mxu1 %vm715_vm0, %v550_v39  ;;  %4865 = vmatprep.subr.msk.mxu0 %vm715_vm0, %v533_v40  ;;  %v583_v39 = vld [vmem:[%s5562_s28 + $0x240] sm:$0xff] }
  0x3f   : > { %4905 = vmatprep.subr.msk.mxu1 %vm715_vm0, %v565_v41  ;;  %v615_v40 = vld [vmem:[%s5562_s28 + $0x340] sm:$0xff]  ;;  %v598_v41 = vld [vmem:[%s5562_s28 + $0x2b8] sm:$0xff] }
  0x41   : > { %4866 = vmatpush3.xpose.msk.msra.mxu0 %vm715_vm0, %v517_v42  ;;  %v630_v42 = vld [vmem:[%s5562_s28 + $0x3b8] sm:$0xff] }
  0x42   : > { %4906 = vmatpush3.xpose.msk.msra.mxu1 %vm715_vm0, %v549_v43  ;;  %4867 = vmatprep.subr.msk.mxu0 %vm715_vm0, %v532_v44  ;;  %v582_v43 = vld [vmem:[%s5562_s28 + $0x238] sm:$0xff] }
  0x43   : > { %4907 = vmatprep.subr.msk.mxu1 %vm715_vm0, %v564_v45  ;;  %v614_v44 = vld [vmem:[%s5562_s28 + $0x338] sm:$0xff]  ;;  %v597_v45 = vld [vmem:[%s5562_s28 + $0x2b0] sm:$0xff] }
  0x45   : > { %4868 = vmatpush3.xpose.msk.msra.mxu0 %vm715_vm0, %v516_v46  ;;  %v629_v46 = vld [vmem:[%s5562_s28 + $0x3b0] sm:$0xff] }
  0x46   : > { %4908 = vmatpush3.xpose.msk.msra.mxu1 %vm715_vm0, %v548_v47  ;;  %4869 = vmatprep.subr.msk.mxu0 %vm715_vm0, %v531_v48  ;;  %v581_v47 = vld [vmem:[%s5562_s28 + $0x230] sm:$0xff] }
  0x47   : > { %4909 = vmatprep.subr.msk.mxu1 %vm715_vm0, %v563_v49  ;;  %v613_v48 = vld [vmem:[%s5562_s28 + $0x330] sm:$0xff]  ;;  %v596_v49 = vld [vmem:[%s5562_s28 + $0x2a8] sm:$0xff] }
  0x49   : > { %4870 = vmatpush3.xpose.msk.msra.mxu0 %vm715_vm0, %v515_v50  ;;  %v628_v50 = vld [vmem:[%s5562_s28 + $0x3a8] sm:$0xff] }
  0x4a   : > { %4910 = vmatpush3.xpose.msk.msra.mxu1 %vm715_vm0, %v547_v51  ;;  %4871 = vmatprep.subr.msk.mxu0 %vm715_vm0, %v530_v52  ;;  %v580_v51 = vld [vmem:[%s5562_s28 + $0x228] sm:$0xff] }
  0x4b   : > { %4911 = vmatprep.subr.msk.mxu1 %vm715_vm0, %v562_v53  ;;  %v612_v52 = vld [vmem:[%s5562_s28 + $0x328] sm:$0xff]  ;;  %v595_v53 = vld [vmem:[%s5562_s28 + $0x2a0] sm:$0xff] }
  0x4d   : > { %4872 = vmatpush3.xpose.msk.msra.mxu0 %vm715_vm0, %v514_v54  ;;  %v627_v54 = vld [vmem:[%s5562_s28 + $0x3a0] sm:$0xff] }
  0x4e   : > { %4912 = vmatpush3.xpose.msk.msra.mxu1 %vm715_vm0, %v546_v55  ;;  %4873 = vmatprep.subr.msk.mxu0 %vm715_vm0, %v529_v56  ;;  %v579_v55 = vld [vmem:[%s5562_s28 + $0x220] sm:$0xff] }
  0x4f   : > { %4913 = vmatprep.subr.msk.mxu1 %vm715_vm0, %v561_v57  ;;  %v611_v56 = vld [vmem:[%s5562_s28 + $0x320] sm:$0xff]  ;;  %v594_v57 = vld [vmem:[%s5562_s28 + $0x298] sm:$0xff] }
  0x51   : > { %4874 = vmatpush3.xpose.msk.msra.mxu0 %vm715_vm0, %v513_v58  ;;  %v626_v58 = vld [vmem:[%s5562_s28 + $0x398] sm:$0xff] }
  0x52   : > { %4914 = vmatpush3.xpose.msk.msra.mxu1 %vm715_vm0, %v545_v59  ;;  %4875 = vmatprep.subr.msk.mxu0 %vm715_vm0, %v528_v60  ;;  %v578_v59 = vld [vmem:[%s5562_s28 + $0x218] sm:$0xff] }
  0x53   : > { %4915 = vmatprep.subr.msk.mxu1 %vm715_vm0, %v560_v61  ;;  %v610_v60 = vld [vmem:[%s5562_s28 + $0x318] sm:$0xff]  ;;  %v593_v61 = vld [vmem:[%s5562_s28 + $0x290] sm:$0xff] }
  0x55   : > { %4876 = vmatpush3.xpose.msk.msra.mxu0 %vm715_vm0, %v512_v62  ;;  %v625_v62 = vld [vmem:[%s5562_s28 + $0x390] sm:$0xff] }
  0x56   : > { %4916 = vmatpush3.xpose.msk.msra.mxu1 %vm715_vm0, %v544_v63  ;;  %4877 = vmatprep.subr.msk.mxu0 %vm715_vm0, %v527_v1  ;;  %v577_v63 = vld [vmem:[%s5562_s28 + $0x210] sm:$0xff] }
  0x57   : > { %4917 = vmatprep.subr.msk.mxu1 %vm715_vm0, %v559_v2  ;;  %v609_v1 = vld [vmem:[%s5562_s28 + $0x310] sm:$0xff]  ;;  %v592_v2 = vld [vmem:[%s5562_s28 + $0x288] sm:$0xff] }
  0x59   : > { %4878 = vmatpush3.xpose.msk.msra.mxu0 %vm715_vm0, %v511_v3  ;;  %v624_v3 = vld [vmem:[%s5562_s28 + $0x388] sm:$0xff] }
  0x5a   : > { %4918 = vmatpush3.xpose.msk.msra.mxu1 %vm715_vm0, %v543_v4  ;;  %4927 = vmatprep.subr.msk.mxu0 %vm715_vm0, %v606_v5  ;;  %v576_v4 = vld [vmem:[%s5562_s28 + $0x208] sm:$0xff] }
  0x5b   : > { %4967 = vmatprep.subr.msk.mxu1 %vm715_vm0, %v638_v6  ;;  %v608_v5 = vld [vmem:[%s5562_s28 + $0x308] sm:$0xff]  ;;  %v591_v6 = vld [vmem:[%s5562_s28 + $0x280] sm:$0xff] }
  0x86   : > { %v5696_v7 = vpop.permute.xlu0 %707  ;;  %v5712_v12 = vpop.permute.xlu1 %711 }
  0x87   : > { %4879 = vmatprep.mubr.msk.f32.mxu0 %vm715_vm0, %v5696_v7  ;;  %4919 = vmatprep.mubr.msk.f32.mxu1 %vm715_vm0, %v5696_v7 }
  0x88   : > { %4880 = vmatmul.mubr.msk.f32.vlgmr.msra.gmra.mxu0 %vm715_vm0, %v5696_v7  ;;  %4920 = vmatmul.mubr.msk.f32.vlgmr.msra.gmra.mxu1 %vm715_vm0, %v5696_v7 }
  0x89   : > { %4928 = vmatpush3.xpose.msk.msra.mxu0 %vm715_vm0, %v590_v8  ;;  %4968 = vmatpush3.xpose.msk.msra.mxu1 %vm715_vm0, %v622_v9  ;;  %v623_v8 = vld [vmem:[%s5562_s28 + $0x380] sm:$0xff] }
  0x8a   : > { %v5714_v13 = vpop.permute.xlu0 %709  ;;  %4929 = vmatprep.subr.msk.mxu0 %vm715_vm0, %v605_v10  ;;  %4969 = vmatprep.subr.msk.mxu1 %vm715_vm0, %v637_v11  ;;  %v5740_v20 = vpop.permute.xlu1 %713  ;;  %v575_v9 = vld [vmem:[%s5562_s28 + $0x200] sm:$0xff]  ;;  %v670_v11 = vld [vmem:[%s5562_s28 + $0x4f8] sm:$0xff] }
  0x8b   : > { %4881 = vmatprep.mubr.msk.f32.mxu0 %vm715_vm0, %v5714_v13  ;;  %4921 = vmatprep.mubr.msk.f32.mxu1 %vm715_vm0, %v5714_v13  ;;  %v607_v10 = vld [vmem:[%s5562_s28 + $0x300] sm:$0xff] }
  0x8c   : > { %4882 = vmatmul.mubr.msk.f32.gmra.mxu0 %vm715_vm0, %v5714_v13  ;;  %4922 = vmatmul.mubr.msk.f32.gmra.mxu1 %vm715_vm0, %v5714_v13 }
  0x8d   : > { %4930 = vmatpush3.xpose.msk.msra.mxu0 %vm715_vm0, %v589_v14  ;;  %4970 = vmatpush3.xpose.msk.msra.mxu1 %vm715_vm0, %v621_v15  ;;  %v702_v14 = vld [vmem:[%s5562_s28 + $0x5f8] sm:$0xff] }
  0x8e   : > { %4883 = vmatprep.mubr.msk.f32.mxu0 %vm715_vm0, %v5712_v12  ;;  %4923 = vmatprep.mubr.msk.f32.mxu1 %vm715_vm0, %v5712_v12  ;;  %v654_v15 = vld [vmem:[%s5562_s28 + $0x478] sm:$0xff] }
  0x8f   : > { %4931 = vmatprep.subr.msk.mxu0 %vm715_vm0, %v604_v16  ;;  %4971 = vmatprep.subr.msk.mxu1 %vm715_vm0, %v636_v17  ;;  %v686_v16 = vld [vmem:[%s5562_s28 + $0x578] sm:$0xff]  ;;  %v669_v17 = vld [vmem:[%s5562_s28 + $0x4f0] sm:$0xff] }
  0x90   : > { %4884 = vmatmul.mubr.msk.f32.gmra.mxu0 %vm715_vm0, %v5712_v12  ;;  %4924 = vmatmul.mubr.msk.f32.gmra.mxu1 %vm715_vm0, %v5712_v12 }
  0x91   : > { %4932 = vmatpush3.xpose.msk.msra.mxu0 %vm715_vm0, %v588_v18  ;;  %4972 = vmatpush3.xpose.msk.msra.mxu1 %vm715_vm0, %v620_v19  ;;  %v701_v18 = vld [vmem:[%s5562_s28 + $0x5f0] sm:$0xff] }
  0x92   : > { %4885 = vmatprep.mubr.msk.f32.mxu0 %vm715_vm0, %v5740_v20  ;;  %4925 = vmatprep.mubr.msk.f32.mxu1 %vm715_vm0, %v5740_v20  ;;  %v653_v19 = vld [vmem:[%s5562_s28 + $0x470] sm:$0xff] }
  0x93   : > { %4933 = vmatprep.subr.msk.mxu0 %vm715_vm0, %v603_v21  ;;  %4973 = vmatprep.subr.msk.mxu1 %vm715_vm0, %v635_v22  ;;  %v685_v21 = vld [vmem:[%s5562_s28 + $0x570] sm:$0xff]  ;;  %v668_v22 = vld [vmem:[%s5562_s28 + $0x4e8] sm:$0xff] }
  0x94   : > { %4886 = vmatmul.mubr.msk.f32.gmra.mxu0 %vm715_vm0, %v5740_v20  ;;  %4926 = vmatmul.mubr.msk.f32.gmra.mxu1 %vm715_vm0, %v5740_v20 }
  0x95   : > { %4934 = vmatpush3.xpose.msk.msra.mxu0 %vm715_vm0, %v587_v23  ;;  %4974 = vmatpush3.xpose.msk.msra.mxu1 %vm715_vm0, %v619_v24  ;;  %v700_v23 = vld [vmem:[%s5562_s28 + $0x5e8] sm:$0xff] }
  0x96   : > { %4959 = vmatprep.mubr.msk.f32.mxu0 %vm715_vm0, %v5696_v7  ;;  %4999 = vmatprep.mubr.msk.f32.mxu1 %vm715_vm0, %v5696_v7  ;;  %v652_v24 = vld [vmem:[%s5562_s28 + $0x468] sm:$0xff] }
  0x97   : > { %4935 = vmatprep.subr.msk.mxu0 %vm715_vm0, %v602_v25  ;;  %4975 = vmatprep.subr.msk.mxu1 %vm715_vm0, %v634_v26  ;;  %v684_v25 = vld [vmem:[%s5562_s28 + $0x568] sm:$0xff]  ;;  %v667_v26 = vld [vmem:[%s5562_s28 + $0x4e0] sm:$0xff] }
  0x99   : > { %4936 = vmatpush3.xpose.msk.msra.mxu0 %vm715_vm0, %v586_v27  ;;  %4976 = vmatpush3.xpose.msk.msra.mxu1 %vm715_vm0, %v618_v28  ;;  %v699_v27 = vld [vmem:[%s5562_s28 + $0x5e0] sm:$0xff] }
  0x9a   : > { %4937 = vmatprep.subr.msk.mxu0 %vm715_vm0, %v601_v29  ;;  %4977 = vmatprep.subr.msk.mxu1 %vm715_vm0, %v633_v30  ;;  %v651_v28 = vld [vmem:[%s5562_s28 + $0x460] sm:$0xff]  ;;  %v666_v30 = vld [vmem:[%s5562_s28 + $0x4d8] sm:$0xff] }
  0x9b   : > { %v683_v29 = vld [vmem:[%s5562_s28 + $0x560] sm:$0xff] }
  0x9d   : > { %4938 = vmatpush3.xpose.msk.msra.mxu0 %vm715_vm0, %v585_v31  ;;  %4978 = vmatpush3.xpose.msk.msra.mxu1 %vm715_vm0, %v617_v32  ;;  %v698_v31 = vld [vmem:[%s5562_s28 + $0x5d8] sm:$0xff] }
  0x9e   : > { %4939 = vmatprep.subr.msk.mxu0 %vm715_vm0, %v600_v33  ;;  %4979 = vmatprep.subr.msk.mxu1 %vm715_vm0, %v632_v34  ;;  %v650_v32 = vld [vmem:[%s5562_s28 + $0x458] sm:$0xff]  ;;  %v665_v34 = vld [vmem:[%s5562_s28 + $0x4d0] sm:$0xff] }
  0x9f   : > { %v682_v33 = vld [vmem:[%s5562_s28 + $0x558] sm:$0xff] }
  0xa1   : > { %4940 = vmatpush3.xpose.msk.msra.mxu0 %vm715_vm0, %v584_v35  ;;  %4980 = vmatpush3.xpose.msk.msra.mxu1 %vm715_vm0, %v616_v36  ;;  %v697_v35 = vld [vmem:[%s5562_s28 + $0x5d0] sm:$0xff] }
  0xa2   : > { %4941 = vmatprep.subr.msk.mxu0 %vm715_vm0, %v599_v37  ;;  %4981 = vmatprep.subr.msk.mxu1 %vm715_vm0, %v631_v38  ;;  %v649_v36 = vld [vmem:[%s5562_s28 + $0x450] sm:$0xff]  ;;  %v664_v38 = vld [vmem:[%s5562_s28 + $0x4c8] sm:$0xff] }
  0xa3   : > { %v681_v37 = vld [vmem:[%s5562_s28 + $0x550] sm:$0xff] }
  0xa5   : > { %4942 = vmatpush3.xpose.msk.msra.mxu0 %vm715_vm0, %v583_v39  ;;  %4982 = vmatpush3.xpose.msk.msra.mxu1 %vm715_vm0, %v615_v40  ;;  %v696_v39 = vld [vmem:[%s5562_s28 + $0x5c8] sm:$0xff] }
  0xa6   : > { %4943 = vmatprep.subr.msk.mxu0 %vm715_vm0, %v598_v41  ;;  %4983 = vmatprep.subr.msk.mxu1 %vm715_vm0, %v630_v42  ;;  %v648_v40 = vld [vmem:[%s5562_s28 + $0x448] sm:$0xff]  ;;  %v663_v42 = vld [vmem:[%s5562_s28 + $0x4c0] sm:$0xff] }
  0xa7   : > { %v680_v41 = vld [vmem:[%s5562_s28 + $0x548] sm:$0xff] }
  0xa9   : > { %4944 = vmatpush3.xpose.msk.msra.mxu0 %vm715_vm0, %v582_v43  ;;  %4984 = vmatpush3.xpose.msk.msra.mxu1 %vm715_vm0, %v614_v44  ;;  %v695_v43 = vld [vmem:[%s5562_s28 + $0x5c0] sm:$0xff] }
  0xaa   : > { %4945 = vmatprep.subr.msk.mxu0 %vm715_vm0, %v597_v45  ;;  %4985 = vmatprep.subr.msk.mxu1 %vm715_vm0, %v629_v46  ;;  %v647_v44 = vld [vmem:[%s5562_s28 + $0x440] sm:$0xff]  ;;  %v662_v46 = vld [vmem:[%s5562_s28 + $0x4b8] sm:$0xff] }
  0xab   : > { %v679_v45 = vld [vmem:[%s5562_s28 + $0x540] sm:$0xff] }
  0xad   : > { %4946 = vmatpush3.xpose.msk.msra.mxu0 %vm715_vm0, %v581_v47  ;;  %4986 = vmatpush3.xpose.msk.msra.mxu1 %vm715_vm0, %v613_v48  ;;  %v694_v47 = vld [vmem:[%s5562_s28 + $0x5b8] sm:$0xff] }
  0xae   : > { %4947 = vmatprep.subr.msk.mxu0 %vm715_vm0, %v596_v49  ;;  %4987 = vmatprep.subr.msk.mxu1 %vm715_vm0, %v628_v50  ;;  %v646_v48 = vld [vmem:[%s5562_s28 + $0x438] sm:$0xff]  ;;  %v661_v50 = vld [vmem:[%s5562_s28 + $0x4b0] sm:$0xff] }
  0xaf   : > { %v678_v49 = vld [vmem:[%s5562_s28 + $0x538] sm:$0xff] }
  0xb1   : > { %4948 = vmatpush3.xpose.msk.msra.mxu0 %vm715_vm0, %v580_v51  ;;  %4988 = vmatpush3.xpose.msk.msra.mxu1 %vm715_vm0, %v612_v52  ;;  %v693_v51 = vld [vmem:[%s5562_s28 + $0x5b0] sm:$0xff] }
  0xb2   : > { %4949 = vmatprep.subr.msk.mxu0 %vm715_vm0, %v595_v53  ;;  %4989 = vmatprep.subr.msk.mxu1 %vm715_vm0, %v627_v54  ;;  %v645_v52 = vld [vmem:[%s5562_s28 + $0x430] sm:$0xff]  ;;  %v660_v54 = vld [vmem:[%s5562_s28 + $0x4a8] sm:$0xff] }
  0xb3   : > { %v677_v53 = vld [vmem:[%s5562_s28 + $0x530] sm:$0xff] }
  0xb5   : > { %4950 = vmatpush3.xpose.msk.msra.mxu0 %vm715_vm0, %v579_v55  ;;  %4990 = vmatpush3.xpose.msk.msra.mxu1 %vm715_vm0, %v611_v56  ;;  %v692_v55 = vld [vmem:[%s5562_s28 + $0x5a8] sm:$0xff] }
  0xb6   : > { %4951 = vmatprep.subr.msk.mxu0 %vm715_vm0, %v594_v57  ;;  %4991 = vmatprep.subr.msk.mxu1 %vm715_vm0, %v626_v58  ;;  %v644_v56 = vld [vmem:[%s5562_s28 + $0x428] sm:$0xff]  ;;  %v659_v58 = vld [vmem:[%s5562_s28 + $0x4a0] sm:$0xff] }
  0xb7   : > { %v676_v57 = vld [vmem:[%s5562_s28 + $0x528] sm:$0xff] }
  0xb9   : > { %4952 = vmatpush3.xpose.msk.msra.mxu0 %vm715_vm0, %v578_v59  ;;  %4992 = vmatpush3.xpose.msk.msra.mxu1 %vm715_vm0, %v610_v60  ;;  %v691_v59 = vld [vmem:[%s5562_s28 + $0x5a0] sm:$0xff] }
  0xba   : > { %4953 = vmatprep.subr.msk.mxu0 %vm715_vm0, %v593_v61  ;;  %4993 = vmatprep.subr.msk.mxu1 %vm715_vm0, %v625_v62  ;;  %v643_v60 = vld [vmem:[%s5562_s28 + $0x420] sm:$0xff]  ;;  %v658_v62 = vld [vmem:[%s5562_s28 + $0x498] sm:$0xff] }
  0xbb   : > { %v675_v61 = vld [vmem:[%s5562_s28 + $0x520] sm:$0xff] }
  0xbd   : > { %4954 = vmatpush3.xpose.msk.msra.mxu0 %vm715_vm0, %v577_v63  ;;  %4994 = vmatpush3.xpose.msk.msra.mxu1 %vm715_vm0, %v609_v1  ;;  %v690_v63 = vld [vmem:[%s5562_s28 + $0x598] sm:$0xff] }
  0xbe   : > { %4955 = vmatprep.subr.msk.mxu0 %vm715_vm0, %v592_v2  ;;  %4995 = vmatprep.subr.msk.mxu1 %vm715_vm0, %v624_v3  ;;  %v642_v1 = vld [vmem:[%s5562_s28 + $0x418] sm:$0xff]  ;;  %v657_v3 = vld [vmem:[%s5562_s28 + $0x490] sm:$0xff] }
  0xbf   : > { %v674_v2 = vld [vmem:[%s5562_s28 + $0x518] sm:$0xff] }
  0xc1   : > { %4956 = vmatpush3.xpose.msk.msra.mxu0 %vm715_vm0, %v576_v4  ;;  %4996 = vmatpush3.xpose.msk.msra.mxu1 %vm715_vm0, %v608_v5  ;;  %v689_v4 = vld [vmem:[%s5562_s28 + $0x590] sm:$0xff] }
  0xc2   : > { %4957 = vmatprep.subr.msk.mxu0 %vm715_vm0, %v591_v6  ;;  %4997 = vmatprep.subr.msk.mxu1 %vm715_vm0, %v623_v8  ;;  %v641_v5 = vld [vmem:[%s5562_s28 + $0x410] sm:$0xff]  ;;  %v656_v8 = vld [vmem:[%s5562_s28 + $0x488] sm:$0xff] }
  0xc3   : > { %v673_v6 = vld [vmem:[%s5562_s28 + $0x510] sm:$0xff] }
  0xc5   : > { %4958 = vmatpush3.xpose.msk.msra.mxu0 %vm715_vm0, %v575_v9  ;;  %4998 = vmatpush3.xpose.msk.msra.mxu1 %vm715_vm0, %v607_v10  ;;  %v688_v9 = vld [vmem:[%s5562_s28 + $0x588] sm:$0xff] }
  0xc6   : > { %5007 = vmatprep.subr.msk.mxu0 %vm715_vm0, %v670_v11  ;;  %5047 = vmatprep.subr.msk.mxu1 %vm715_vm0, %v702_v14  ;;  %v640_v10 = vld [vmem:[%s5562_s28 + $0x408] sm:$0xff]  ;;  %v655_v14 = vld [vmem:[%s5562_s28 + $0x480] sm:$0xff] }
  0xc7   : > { %v672_v11 = vld [vmem:[%s5562_s28 + $0x508] sm:$0xff] }
  0xc8   : > { %4960 = vmatmul.mubr.msk.f32.vlgmr.msra.gmra.mxu0 %vm715_vm0, %v5696_v7  ;;  %5000 = vmatmul.mubr.msk.f32.vlgmr.msra.gmra.mxu1 %vm715_vm0, %v5696_v7 }
  0xc9   : > { %4961 = vmatprep.mubr.msk.f32.mxu0 %vm715_vm0, %v5714_v13  ;;  %5001 = vmatprep.mubr.msk.f32.mxu1 %vm715_vm0, %v5714_v13 }
  0xca   : > { %5008 = vmatpush3.xpose.msk.msra.mxu0 %vm715_vm0, %v654_v15  ;;  %5048 = vmatpush3.xpose.msk.msra.mxu1 %vm715_vm0, %v686_v16  ;;  %v687_v15 = vld [vmem:[%s5562_s28 + $0x580] sm:$0xff] }
  0xcb   : > { %5009 = vmatprep.subr.msk.mxu0 %vm715_vm0, %v669_v17  ;;  %5049 = vmatprep.subr.msk.mxu1 %vm715_vm0, %v701_v18  ;;  %v639_v16 = vld [vmem:[%s5562_s28 + $0x400] sm:$0xff]  ;;  %v350_v18 = vld [vmem:[%s6021_s10 + $0xf8] sm:$0xff] }
  0xcc   : > { %4962 = vmatmul.mubr.msk.f32.gmra.mxu0 %vm715_vm0, %v5714_v13  ;;  %5002 = vmatmul.mubr.msk.f32.gmra.mxu1 %vm715_vm0, %v5714_v13  ;;  %v671_v17 = vld [vmem:[%s5562_s28 + $0x500] sm:$0xff] }
  0xcd   : > { %4963 = vmatprep.mubr.msk.f32.mxu0 %vm715_vm0, %v5712_v12  ;;  %5003 = vmatprep.mubr.msk.f32.mxu1 %vm715_vm0, %v5712_v12 }
  0xce   : > { %5010 = vmatpush3.xpose.msk.msra.mxu0 %vm715_vm0, %v653_v19  ;;  %5050 = vmatpush3.xpose.msk.msra.mxu1 %vm715_vm0, %v685_v21  ;;  %v382_v19 = vld [vmem:[%s6021_s10 + $0x1f8] sm:$0xff] }
  0xcf   : > { %5011 = vmatprep.subr.msk.mxu0 %vm715_vm0, %v668_v22  ;;  %5051 = vmatprep.subr.msk.mxu1 %vm715_vm0, %v700_v23  ;;  %v334_v21 = vld [vmem:[%s6021_s10 + $0x78] sm:$0xff]  ;;  %v349_v23 = vld [vmem:[%s6021_s10 + $0xf0] sm:$0xff] }
  0xd0   : > { %4964 = vmatmul.mubr.msk.f32.gmra.mxu0 %vm715_vm0, %v5712_v12  ;;  %5004 = vmatmul.mubr.msk.f32.gmra.mxu1 %vm715_vm0, %v5712_v12  ;;  %v366_v22 = vld [vmem:[%s6021_s10 + $0x178] sm:$0xff] }
  0xd1   : > { %4965 = vmatprep.mubr.msk.f32.mxu0 %vm715_vm0, %v5740_v20  ;;  %5005 = vmatprep.mubr.msk.f32.mxu1 %vm715_vm0, %v5740_v20 }
  0xd2   : > { %5012 = vmatpush3.xpose.msk.msra.mxu0 %vm715_vm0, %v652_v24  ;;  %5052 = vmatpush3.xpose.msk.msra.mxu1 %vm715_vm0, %v684_v25  ;;  %v381_v24 = vld [vmem:[%s6021_s10 + $0x1f0] sm:$0xff] }
  0xd3   : > { %5013 = vmatprep.subr.msk.mxu0 %vm715_vm0, %v667_v26  ;;  %5053 = vmatprep.subr.msk.mxu1 %vm715_vm0, %v699_v27  ;;  %v333_v25 = vld [vmem:[%s6021_s10 + $0x70] sm:$0xff]  ;;  %v348_v26 = vld [vmem:[%s6021_s10 + $0xe8] sm:$0xff] }
  0xd4   : > { %4966 = vmatmul.mubr.msk.f32.gmra.mxu0 %vm715_vm0, %v5740_v20  ;;  %5006 = vmatmul.mubr.msk.f32.gmra.mxu1 %vm715_vm0, %v5740_v20  ;;  %v380_v27 = vld [vmem:[%s6021_s10 + $0x1e8] sm:$0xff] }
  0xd5   : > { %5039 = vmatprep.mubr.msk.f32.mxu0 %vm715_vm0, %v5696_v7  ;;  %5079 = vmatprep.mubr.msk.f32.mxu1 %vm715_vm0, %v5696_v7 }
  0xd6   : > { %5014 = vmatpush3.xpose.msk.msra.mxu0 %vm715_vm0, %v651_v28  ;;  %5054 = vmatpush3.xpose.msk.msra.mxu1 %vm715_vm0, %v683_v29  ;;  %v332_v28 = vld [vmem:[%s6021_s10 + $0x68] sm:$0xff]  ;;  %v347_v29 = vld [vmem:[%s6021_s10 + $0xe0] sm:$0xff] }
  0xd7   : > { %5015 = vmatprep.subr.msk.mxu0 %vm715_vm0, %v666_v30  ;;  %5055 = vmatprep.subr.msk.mxu1 %vm715_vm0, %v698_v31  ;;  %v379_v30 = vld [vmem:[%s6021_s10 + $0x1e0] sm:$0xff] }
  0xd8   : > { %v331_v31 = vld [vmem:[%s6021_s10 + $0x60] sm:$0xff] }
  0xda   : > { %5016 = vmatpush3.xpose.msk.msra.mxu0 %vm715_vm0, %v650_v32  ;;  %5056 = vmatpush3.xpose.msk.msra.mxu1 %vm715_vm0, %v682_v33  ;;  %v346_v32 = vld [vmem:[%s6021_s10 + $0xd8] sm:$0xff] }
  0xdb   : > { %5017 = vmatprep.subr.msk.mxu0 %vm715_vm0, %v665_v34  ;;  %5057 = vmatprep.subr.msk.mxu1 %vm715_vm0, %v697_v35  ;;  %v378_v33 = vld [vmem:[%s6021_s10 + $0x1d8] sm:$0xff] }
  0xdc   : > { %v2955_v34 = vld [vmem:[%s7030_s5 + $0x18] sm:$0x1] }
  0xdd   : > { %v330_v35 = vld [vmem:[%s6021_s10 + $0x58] sm:$0xff] }
  0xde   : > { %5018 = vmatpush3.xpose.msk.msra.mxu0 %vm715_vm0, %v649_v36  ;;  %5058 = vmatpush3.xpose.msk.msra.mxu1 %vm715_vm0, %v681_v37  ;;  %v345_v36 = vld [vmem:[%s6021_s10 + $0xd0] sm:$0xff] }
  0xdf   : > { %5019 = vmatprep.subr.msk.mxu0 %vm715_vm0, %v664_v38  ;;  %5059 = vmatprep.subr.msk.mxu1 %vm715_vm0, %v696_v39  ;;  %v377_v37 = vld [vmem:[%s6021_s10 + $0x1d0] sm:$0xff]  ;;  %v5449_v38 = vmov 0   ;;  %v2952_v39 = vld [vmem:[%s7030_s5] sm:$0xff] }
  0xe0   : > { %5373 = vset.pattern.permute.xlu0 %v5449_v38  ;;  %5374 = vset.pattern.permute.xlu1 %v5449_v38  ;;  %v427_v38 = vld [vmem:[%s6021_s10 + $0x360] sm:$0xff] }
  0xe1   : > { %2973 = vperm.xlu0 %5373, %v2955_v34   ;;  %v396_v34 = vld [vmem:[%s6021_s10 + $0x268] sm:$0xff] }
  0xe2   : > { %5020 = vmatpush3.xpose.msk.msra.mxu0 %vm715_vm0, %v648_v40  ;;  %5060 = vmatpush3.xpose.msk.msra.mxu1 %vm715_vm0, %v680_v41  ;;  %v2953_v40 = vld [vmem:[%s7030_s5 + $0x8] sm:$0xff]  ;;  %v329_v41 = vld [vmem:[%s6021_s10 + $0x50] sm:$0xff] }
  0xe3   : > { %5021 = vmatprep.subr.msk.mxu0 %vm715_vm0, %v663_v42  ;;  %5061 = vmatprep.subr.msk.mxu1 %vm715_vm0, %v695_v43  ;;  %v361_v42 = vld [vmem:[%s6021_s10 + $0x150] sm:$0xff]  ;;  %v344_v43 = vld [vmem:[%s6021_s10 + $0xc8] sm:$0xff] }
  0xe5   : > { %2958 = vperm.xlu0 %5373, %v2952_v39   ;;  %v410_v39 = vld [vmem:[%s6021_s10 + $0x2d8] sm:$0xff] }
  0xe6   : > { %5022 = vmatpush3.xpose.msk.msra.mxu0 %vm715_vm0, %v647_v44  ;;  %5062 = vmatpush3.xpose.msk.msra.mxu1 %vm715_vm0, %v679_v45  ;;  %v376_v44 = vld [vmem:[%s6021_s10 + $0x1c8] sm:$0xff] }
  0xe7   : > { %5023 = vmatprep.subr.msk.mxu0 %vm715_vm0, %v662_v46  ;;  %5063 = vmatprep.subr.msk.mxu1 %vm715_vm0, %v694_v47  ;;  %v328_v45 = vld [vmem:[%s6021_s10 + $0x48] sm:$0xff]  ;;  %v343_v47 = vld [vmem:[%s6021_s10 + $0xc0] sm:$0xff] }
  0xe8   : > { %v360_v46 = vld [vmem:[%s6021_s10 + $0x148] sm:$0xff] }
  0xea   : > { %5024 = vmatpush3.xpose.msk.msra.mxu0 %vm715_vm0, %v646_v48  ;;  %5064 = vmatpush3.xpose.msk.msra.mxu1 %vm715_vm0, %v678_v49  ;;  %v375_v48 = vld [vmem:[%s6021_s10 + $0x1c0] sm:$0xff] }
  0xeb   : > { %5025 = vmatprep.subr.msk.mxu0 %vm715_vm0, %v661_v50  ;;  %5065 = vmatprep.subr.msk.mxu1 %vm715_vm0, %v693_v51  ;;  %v327_v49 = vld [vmem:[%s6021_s10 + $0x40] sm:$0xff]  ;;  %v342_v51 = vld [vmem:[%s6021_s10 + $0xb8] sm:$0xff] }
  0xec   : > { %v359_v50 = vld [vmem:[%s6021_s10 + $0x140] sm:$0xff] }
  0xee   : > { %5026 = vmatpush3.xpose.msk.msra.mxu0 %vm715_vm0, %v645_v52  ;;  %5066 = vmatpush3.xpose.msk.msra.mxu1 %vm715_vm0, %v677_v53  ;;  %v374_v52 = vld [vmem:[%s6021_s10 + $0x1b8] sm:$0xff] }
  0xef   : > { %5027 = vmatprep.subr.msk.mxu0 %vm715_vm0, %v660_v54  ;;  %5067 = vmatprep.subr.msk.mxu1 %vm715_vm0, %v692_v55  ;;  %v326_v53 = vld [vmem:[%s6021_s10 + $0x38] sm:$0xff]  ;;  %v341_v55 = vld [vmem:[%s6021_s10 + $0xb0] sm:$0xff] }
  0xf0   : > { %v358_v54 = vld [vmem:[%s6021_s10 + $0x138] sm:$0xff] }
  0xf2   : > { %5028 = vmatpush3.xpose.msk.msra.mxu0 %vm715_vm0, %v644_v56  ;;  %5068 = vmatpush3.xpose.msk.msra.mxu1 %vm715_vm0, %v676_v57  ;;  %v373_v56 = vld [vmem:[%s6021_s10 + $0x1b0] sm:$0xff] }
  0xf3   : > { %5029 = vmatprep.subr.msk.mxu0 %vm715_vm0, %v659_v58  ;;  %5069 = vmatprep.subr.msk.mxu1 %vm715_vm0, %v691_v59  ;;  %v325_v57 = vld [vmem:[%s6021_s10 + $0x30] sm:$0xff]  ;;  %v340_v59 = vld [vmem:[%s6021_s10 + $0xa8] sm:$0xff] }
  0xf4   : > { %v357_v58 = vld [vmem:[%s6021_s10 + $0x130] sm:$0xff] }
  0xf6   : > { %5030 = vmatpush3.xpose.msk.msra.mxu0 %vm715_vm0, %v643_v60  ;;  %5070 = vmatpush3.xpose.msk.msra.mxu1 %vm715_vm0, %v675_v61  ;;  %v372_v60 = vld [vmem:[%s6021_s10 + $0x1a8] sm:$0xff] }
  0xf7   : > { %5031 = vmatprep.subr.msk.mxu0 %vm715_vm0, %v658_v62  ;;  %5071 = vmatprep.subr.msk.mxu1 %vm715_vm0, %v690_v63  ;;  %v324_v61 = vld [vmem:[%s6021_s10 + $0x28] sm:$0xff]  ;;  %v339_v63 = vld [vmem:[%s6021_s10 + $0xa0] sm:$0xff] }
  0xf8   : > { %v356_v62 = vld [vmem:[%s6021_s10 + $0x128] sm:$0xff] }
  0xfa   : > { %5032 = vmatpush3.xpose.msk.msra.mxu0 %vm715_vm0, %v642_v1  ;;  %5072 = vmatpush3.xpose.msk.msra.mxu1 %vm715_vm0, %v674_v2  ;;  %v371_v1 = vld [vmem:[%s6021_s10 + $0x1a0] sm:$0xff] }
  0xfb   : > { %5033 = vmatprep.subr.msk.mxu0 %vm715_vm0, %v657_v3  ;;  %5073 = vmatprep.subr.msk.mxu1 %vm715_vm0, %v689_v4  ;;  %v323_v2 = vld [vmem:[%s6021_s10 + $0x20] sm:$0xff]  ;;  %v338_v4 = vld [vmem:[%s6021_s10 + $0x98] sm:$0xff] }
  0xfc   : > { %v355_v3 = vld [vmem:[%s6021_s10 + $0x120] sm:$0xff] }
  0xfe   : > { %5034 = vmatpush3.xpose.msk.msra.mxu0 %vm715_vm0, %v641_v5  ;;  %5074 = vmatpush3.xpose.msk.msra.mxu1 %vm715_vm0, %v673_v6  ;;  %v370_v5 = vld [vmem:[%s6021_s10 + $0x198] sm:$0xff] }
  0xff   : > { %5035 = vmatprep.subr.msk.mxu0 %vm715_vm0, %v656_v8  ;;  %5075 = vmatprep.subr.msk.mxu1 %vm715_vm0, %v688_v9  ;;  %v322_v6 = vld [vmem:[%s6021_s10 + $0x18] sm:$0xff]  ;;  %v337_v9 = vld [vmem:[%s6021_s10 + $0x90] sm:$0xff] }
 0x100   : > { %v354_v8 = vld [vmem:[%s6021_s10 + $0x118] sm:$0xff] }
 0x102   : > { %5036 = vmatpush3.xpose.msk.msra.mxu0 %vm715_vm0, %v640_v10  ;;  %5076 = vmatpush3.xpose.msk.msra.mxu1 %vm715_vm0, %v672_v11  ;;  %v369_v10 = vld [vmem:[%s6021_s10 + $0x190] sm:$0xff] }
 0x103   : > { %5037 = vmatprep.subr.msk.mxu0 %vm715_vm0, %v655_v14  ;;  %5077 = vmatprep.subr.msk.mxu1 %vm715_vm0, %v687_v15  ;;  %v321_v11 = vld [vmem:[%s6021_s10 + $0x10] sm:$0xff]  ;;  %v336_v15 = vld [vmem:[%s6021_s10 + $0x88] sm:$0xff] }
 0x104   : > { %v353_v14 = vld [vmem:[%s6021_s10 + $0x110] sm:$0xff] }
 0x106   : > { %5038 = vmatpush3.xpose.msk.msra.mxu0 %vm715_vm0, %v639_v16  ;;  %5078 = vmatpush3.xpose.msk.msra.mxu1 %vm715_vm0, %v671_v17  ;;  %v368_v16 = vld [vmem:[%s6021_s10 + $0x188] sm:$0xff] }
 0x107   : > { %5087 = vmatprep.subr.msk.mxu0 %vm715_vm0, %v350_v18  ;;  %5127 = vmatprep.subr.msk.mxu1 %vm715_vm0, %v382_v19  ;;  %v320_v17 = vld [vmem:[%s6021_s10 + $0x8] sm:$0xff]  ;;  %v335_v19 = vld [vmem:[%s6021_s10 + $0x80] sm:$0xff] }
 0x108   : > { %v352_v18 = vld [vmem:[%s6021_s10 + $0x108] sm:$0xff] }
 0x109   : > { %5040 = vmatmul.mubr.msk.f32.vlgmr.msra.gmra.mxu0 %vm715_vm0, %v5696_v7  ;;  %5080 = vmatmul.mubr.msk.f32.vlgmr.msra.gmra.mxu1 %vm715_vm0, %v5696_v7  ;;  %v365_v7 = vld [vmem:[%s6021_s10 + $0x170] sm:$0xff] }
 0x10a   : > { %5041 = vmatprep.mubr.msk.f32.mxu0 %vm715_vm0, %v5714_v13  ;;  %5081 = vmatprep.mubr.msk.f32.mxu1 %vm715_vm0, %v5714_v13 }
 0x10b   : > { %5088 = vmatpush3.xpose.msk.msra.mxu0 %vm715_vm0, %v334_v21  ;;  %5128 = vmatpush3.xpose.msk.msra.mxu1 %vm715_vm0, %v366_v22  ;;  %v367_v21 = vld [vmem:[%s6021_s10 + $0x180] sm:$0xff] }
 0x10c   : > { %5089 = vmatprep.subr.msk.mxu0 %vm715_vm0, %v349_v23  ;;  %5129 = vmatprep.subr.msk.mxu1 %vm715_vm0, %v381_v24  ;;  %v319_v22 = vld [vmem:[%s6021_s10] sm:$0xff]  ;;  %v414_v24 = vld [vmem:[%s6021_s10 + $0x2f8] sm:$0xff] }
 0x10d   : > { %5042 = vmatmul.mubr.msk.f32.gmra.mxu0 %vm715_vm0, %v5714_v13  ;;  %5082 = vmatmul.mubr.msk.f32.gmra.mxu1 %vm715_vm0, %v5714_v13  ;;  %v364_v13 = vld [vmem:[%s6021_s10 + $0x168] sm:$0xff]  ;;  %v351_v23 = vld [vmem:[%s6021_s10 + $0x100] sm:$0xff] }
 0x10e   : > { %5043 = vmatprep.mubr.msk.f32.mxu0 %vm715_vm0, %v5712_v12  ;;  %5083 = vmatprep.mubr.msk.f32.mxu1 %vm715_vm0, %v5712_v12 }
 0x10f   : > { %5090 = vmatpush3.xpose.msk.msra.mxu0 %vm715_vm0, %v333_v25  ;;  %5130 = vmatpush3.xpose.msk.msra.mxu1 %vm715_vm0, %v365_v7  ;;  %v446_v25 = vld [vmem:[%s6021_s10 + $0x3f8] sm:$0xff] }
 0x110   : > { %5091 = vmatprep.subr.msk.mxu0 %vm715_vm0, %v348_v26  ;;  %5131 = vmatprep.subr.msk.mxu1 %vm715_vm0, %v380_v27  ;;  %v398_v7 = vld [vmem:[%s6021_s10 + $0x278] sm:$0xff]  ;;  %v6212_v27 = vld [vmem:[%s7027_s2] sm:$0xff] }
 0x111   : > { %5044 = vmatmul.mubr.msk.f32.gmra.mxu0 %vm715_vm0, %v5712_v12  ;;  %5084 = vmatmul.mubr.msk.f32.gmra.mxu1 %vm715_vm0, %v5712_v12  ;;  %v363_v12 = vld [vmem:[%s6021_s10 + $0x160] sm:$0xff]  ;;  %v430_v26 = vld [vmem:[%s6021_s10 + $0x378] sm:$0xff] }
 0x112   : > { %5045 = vmatprep.mubr.msk.f32.mxu0 %vm715_vm0, %v5740_v20  ;;  %5085 = vmatprep.mubr.msk.f32.mxu1 %vm715_vm0, %v5740_v20 }
 0x113   : > { %5092 = vmatpush3.xpose.msk.msra.mxu0 %vm715_vm0, %v332_v28  ;;  %5132 = vmatpush3.xpose.msk.msra.mxu1 %vm715_vm0, %v364_v13  ;;  %v413_v28 = vld [vmem:[%s6021_s10 + $0x2f0] sm:$0xff] }
 0x114   : > { %5093 = vmatprep.subr.msk.mxu0 %vm715_vm0, %v347_v29  ;;  %5133 = vmatprep.subr.msk.mxu1 %vm715_vm0, %v379_v30  ;;  %v445_v13 = vld [vmem:[%s6021_s10 + $0x3f0] sm:$0xff]  ;;  %v6225_v29 = vld [vmem:[%s7027_s2 + $0x8] sm:$0xff] }
 0x115   : > { %5046 = vmatmul.mubr.msk.f32.gmra.mxu0 %vm715_vm0, %v5740_v20  ;;  %5086 = vmatmul.mubr.msk.f32.gmra.mxu1 %vm715_vm0, %v5740_v20  ;;  %v2954_v20 = vld [vmem:[%s7030_s5 + $0x10] sm:$0xff] }
 0x116   : > { %5119 = vmatprep.mubr.msk.f32.mxu0 %vm715_vm0, %v5541_v0  ;;  %5159 = vmatprep.mubr.msk.f32.mxu1 %vm715_vm0, %v5541_v0  ;;  %v362_v0 = vld [vmem:[%s6021_s10 + $0x158] sm:$0xff]  ;;  %v397_v30 = vld [vmem:[%s6021_s10 + $0x270] sm:$0xff] }
 0x117   : > { %5094 = vmatpush3.xpose.msk.msra.mxu0 %vm715_vm0, %v331_v31  ;;  %5134 = vmatpush3.xpose.msk.msra.mxu1 %vm715_vm0, %v363_v12  ;;  %v429_v31 = vld [vmem:[%s6021_s10 + $0x370] sm:$0xff]  ;;  %v412_v12 = vld [vmem:[%s6021_s10 + $0x2e8] sm:$0xff] }
 0x118   : > { %5095 = vmatprep.subr.msk.mxu0 %vm715_vm0, %v346_v32  ;;  %5135 = vmatprep.subr.msk.mxu1 %vm715_vm0, %v378_v33  ;;  %v444_v32 = vld [vmem:[%s6021_s10 + $0x3e8] sm:$0xff]  ;;  %v6246_v33 = vld [vmem:[%s7027_s2 + $0x10] sm:$0xff] }
 0x119   : > { %2968 = vperm.xlu1 %5374, %v2954_v20   ;;  %v428_v20 = vld [vmem:[%s6021_s10 + $0x368] sm:$0xff] }
 0x11b   : > { %5096 = vmatpush3.xpose.msk.msra.mxu0 %vm715_vm0, %v330_v35  ;;  %5136 = vmatpush3.xpose.msk.msra.mxu1 %vm715_vm0, %v362_v0  ;;  %v411_v35 = vld [vmem:[%s6021_s10 + $0x2e0] sm:$0xff] }
 0x11c   : > { %5097 = vmatprep.subr.msk.mxu0 %vm715_vm0, %v345_v36  ;;  %5137 = vmatprep.subr.msk.mxu1 %vm715_vm0, %v377_v37  ;;  %v443_v0 = vld [vmem:[%s6021_s10 + $0x3e0] sm:$0xff]  ;;  %v6267_v36 = vld [vmem:[%s7027_s2 + $0x18] sm:$0x1] }
 0x11d   : > { %2963 = vperm.xlu1 %5374, %v2953_v40   ;;  %v395_v37 = vld [vmem:[%s6021_s10 + $0x260] sm:$0xff]  ;;  %v442_v40 = vld [vmem:[%s6021_s10 + $0x3d8] sm:$0xff] }
 0x11f   : > { %5098 = vmatpush3.xpose.msk.msra.mxu0 %vm715_vm0, %v329_v41  ;;  %5138 = vmatpush3.xpose.msk.msra.mxu1 %vm715_vm0, %v361_v42  ;;  %v394_v41 = vld [vmem:[%s6021_s10 + $0x258] sm:$0xff] }
 0x120   : > { %5099 = vmatprep.subr.msk.mxu0 %vm715_vm0, %v344_v43  ;;  %5139 = vmatprep.subr.msk.mxu1 %vm715_vm0, %v376_v44  ;;  %v426_v42 = vld [vmem:[%s6021_s10 + $0x358] sm:$0xff]  ;;  %v409_v43 = vld [vmem:[%s6021_s10 + $0x2d0] sm:$0xff] }
 0x121   : > { %v441_v44 = vld [vmem:[%s6021_s10 + $0x3d0] sm:$0xff] }
 0x123   : > { %5100 = vmatpush3.xpose.msk.msra.mxu0 %vm715_vm0, %v328_v45  ;;  %5140 = vmatpush3.xpose.msk.msra.mxu1 %vm715_vm0, %v360_v46  ;;  %v393_v45 = vld [vmem:[%s6021_s10 + $0x250] sm:$0xff] }
 0x124   : > { %5101 = vmatprep.subr.msk.mxu0 %vm715_vm0, %v343_v47  ;;  %5141 = vmatprep.subr.msk.mxu1 %vm715_vm0, %v375_v48  ;;  %v425_v46 = vld [vmem:[%s6021_s10 + $0x350] sm:$0xff]  ;;  %v408_v47 = vld [vmem:[%s6021_s10 + $0x2c8] sm:$0xff] }
 0x125   : > { %v440_v48 = vld [vmem:[%s6021_s10 + $0x3c8] sm:$0xff] }
 0x127   : > { %5102 = vmatpush3.xpose.msk.msra.mxu0 %vm715_vm0, %v327_v49  ;;  %5142 = vmatpush3.xpose.msk.msra.mxu1 %vm715_vm0, %v359_v50  ;;  %v392_v49 = vld [vmem:[%s6021_s10 + $0x248] sm:$0xff] }
 0x128   : > { %5103 = vmatprep.subr.msk.mxu0 %vm715_vm0, %v342_v51  ;;  %5143 = vmatprep.subr.msk.mxu1 %vm715_vm0, %v374_v52  ;;  %v424_v50 = vld [vmem:[%s6021_s10 + $0x348] sm:$0xff]  ;;  %v407_v51 = vld [vmem:[%s6021_s10 + $0x2c0] sm:$0xff] }
 0x129   : > { %v439_v52 = vld [vmem:[%s6021_s10 + $0x3c0] sm:$0xff] }
 0x12b   : > { %5104 = vmatpush3.xpose.msk.msra.mxu0 %vm715_vm0, %v326_v53  ;;  %5144 = vmatpush3.xpose.msk.msra.mxu1 %vm715_vm0, %v358_v54  ;;  %v391_v53 = vld [vmem:[%s6021_s10 + $0x240] sm:$0xff] }
 0x12c   : > { %5105 = vmatprep.subr.msk.mxu0 %vm715_vm0, %v341_v55  ;;  %5145 = vmatprep.subr.msk.mxu1 %vm715_vm0, %v373_v56  ;;  %v423_v54 = vld [vmem:[%s6021_s10 + $0x340] sm:$0xff]  ;;  %v406_v55 = vld [vmem:[%s6021_s10 + $0x2b8] sm:$0xff] }
 0x12d   : > { %v438_v56 = vld [vmem:[%s6021_s10 + $0x3b8] sm:$0xff] }
 0x12f   : > { %5106 = vmatpush3.xpose.msk.msra.mxu0 %vm715_vm0, %v325_v57  ;;  %5146 = vmatpush3.xpose.msk.msra.mxu1 %vm715_vm0, %v357_v58  ;;  %v390_v57 = vld [vmem:[%s6021_s10 + $0x238] sm:$0xff] }
 0x130   : > { %5107 = vmatprep.subr.msk.mxu0 %vm715_vm0, %v340_v59  ;;  %5147 = vmatprep.subr.msk.mxu1 %vm715_vm0, %v372_v60  ;;  %v422_v58 = vld [vmem:[%s6021_s10 + $0x338] sm:$0xff]  ;;  %v405_v59 = vld [vmem:[%s6021_s10 + $0x2b0] sm:$0xff] }
 0x131   : > { %v437_v60 = vld [vmem:[%s6021_s10 + $0x3b0] sm:$0xff] }
 0x133   : > { %5108 = vmatpush3.xpose.msk.msra.mxu0 %vm715_vm0, %v324_v61  ;;  %5148 = vmatpush3.xpose.msk.msra.mxu1 %vm715_vm0, %v356_v62  ;;  %v389_v61 = vld [vmem:[%s6021_s10 + $0x230] sm:$0xff] }
 0x134   : > { %5109 = vmatprep.subr.msk.mxu0 %vm715_vm0, %v339_v63  ;;  %5149 = vmatprep.subr.msk.mxu1 %vm715_vm0, %v371_v1  ;;  %v421_v62 = vld [vmem:[%s6021_s10 + $0x330] sm:$0xff]  ;;  %v404_v63 = vld [vmem:[%s6021_s10 + $0x2a8] sm:$0xff] }
 0x135   : > { %v436_v1 = vld [vmem:[%s6021_s10 + $0x3a8] sm:$0xff] }
 0x137   : > { %5110 = vmatpush3.xpose.msk.msra.mxu0 %vm715_vm0, %v323_v2  ;;  %5150 = vmatpush3.xpose.msk.msra.mxu1 %vm715_vm0, %v355_v3  ;;  %v388_v2 = vld [vmem:[%s6021_s10 + $0x228] sm:$0xff] }
 0x138   : > { %5111 = vmatprep.subr.msk.mxu0 %vm715_vm0, %v338_v4  ;;  %5151 = vmatprep.subr.msk.mxu1 %vm715_vm0, %v370_v5  ;;  %v420_v3 = vld [vmem:[%s6021_s10 + $0x328] sm:$0xff]  ;;  %v403_v4 = vld [vmem:[%s6021_s10 + $0x2a0] sm:$0xff] }
 0x139   : > { %v435_v5 = vld [vmem:[%s6021_s10 + $0x3a0] sm:$0xff] }
 0x13b   : > { %5112 = vmatpush3.xpose.msk.msra.mxu0 %vm715_vm0, %v322_v6  ;;  %5152 = vmatpush3.xpose.msk.msra.mxu1 %vm715_vm0, %v354_v8  ;;  %v387_v6 = vld [vmem:[%s6021_s10 + $0x220] sm:$0xff] }
 0x13c   : > { %5113 = vmatprep.subr.msk.mxu0 %vm715_vm0, %v337_v9  ;;  %5153 = vmatprep.subr.msk.mxu1 %vm715_vm0, %v369_v10  ;;  %v419_v8 = vld [vmem:[%s6021_s10 + $0x320] sm:$0xff]  ;;  %v402_v9 = vld [vmem:[%s6021_s10 + $0x298] sm:$0xff] }
 0x13d   : > { %v434_v10 = vld [vmem:[%s6021_s10 + $0x398] sm:$0xff] }
 0x13f   : > { %5114 = vmatpush3.xpose.msk.msra.mxu0 %vm715_vm0, %v321_v11  ;;  %5154 = vmatpush3.xpose.msk.msra.mxu1 %vm715_vm0, %v353_v14  ;;  %v386_v11 = vld [vmem:[%s6021_s10 + $0x218] sm:$0xff] }
 0x140   : > { %5115 = vmatprep.subr.msk.mxu0 %vm715_vm0, %v336_v15  ;;  %5155 = vmatprep.subr.msk.mxu1 %vm715_vm0, %v368_v16  ;;  %v418_v14 = vld [vmem:[%s6021_s10 + $0x318] sm:$0xff]  ;;  %v401_v15 = vld [vmem:[%s6021_s10 + $0x290] sm:$0xff] }
 0x141   : > { %v433_v16 = vld [vmem:[%s6021_s10 + $0x390] sm:$0xff] }
 0x143   : > { %5116 = vmatpush3.xpose.msk.msra.mxu0 %vm715_vm0, %v320_v17  ;;  %5156 = vmatpush3.xpose.msk.msra.mxu1 %vm715_vm0, %v352_v18  ;;  %v385_v17 = vld [vmem:[%s6021_s10 + $0x210] sm:$0xff] }
 0x144   : > { %5117 = vmatprep.subr.msk.mxu0 %vm715_vm0, %v335_v19  ;;  %5157 = vmatprep.subr.msk.mxu1 %vm715_vm0, %v367_v21  ;;  %v417_v18 = vld [vmem:[%s6021_s10 + $0x310] sm:$0xff]  ;;  %v400_v19 = vld [vmem:[%s6021_s10 + $0x288] sm:$0xff] }
 0x145   : > { %v432_v21 = vld [vmem:[%s6021_s10 + $0x388] sm:$0xff] }
 0x147   : > { %5118 = vmatpush3.xpose.msk.msra.mxu0 %vm715_vm0, %v319_v22  ;;  %5158 = vmatpush3.xpose.msk.msra.mxu1 %vm715_vm0, %v351_v23  ;;  %v384_v22 = vld [vmem:[%s6021_s10 + $0x208] sm:$0xff] }
 0x148   : > { %5167 = vmatprep.subr.msk.mxu0 %vm715_vm0, %v414_v24  ;;  %5207 = vmatprep.subr.msk.mxu1 %vm715_vm0, %v446_v25  ;;  %v416_v23 = vld [vmem:[%s6021_s10 + $0x308] sm:$0xff]  ;;  %v399_v24 = vld [vmem:[%s6021_s10 + $0x280] sm:$0xff] }
 0x149   : > { %v431_v25 = vld [vmem:[%s6021_s10 + $0x380] sm:$0xff] }
 0x14a   : > { %5120 = vmatmul.mubr.msk.f32.vlgmr.msra.gmra.mxu0 %vm715_vm0, %v6212_v27  ;;  %5160 = vmatmul.mubr.msk.f32.vlgmr.msra.gmra.mxu1 %vm715_vm0, %v6212_v27 }
 0x14b   : > { %5168 = vmatpush3.xpose.msk.msra.mxu0 %vm715_vm0, %v398_v7  ;;  %5208 = vmatpush3.xpose.msk.msra.mxu1 %vm715_vm0, %v430_v26  ;;  %v383_v7 = vld [vmem:[%s6021_s10 + $0x200] sm:$0xff] }
 0x14c   : > { %5121 = vmatprep.mubr.msk.f32.mxu0 %vm715_vm0, %v6225_v29  ;;  %5161 = vmatprep.mubr.msk.f32.mxu1 %vm715_vm0, %v6225_v29  ;;  %v415_v26 = vld [vmem:[%s6021_s10 + $0x300] sm:$0xff] }
 0x14d   : > { %5169 = vmatprep.subr.msk.mxu0 %vm715_vm0, %v413_v28  ;;  %5209 = vmatprep.subr.msk.mxu1 %vm715_vm0, %v445_v13  ;;  %v478_v28 = vld [vmem:[%s6021_s10 + $0x4f8] sm:$0xff] }
 0x14e   : > { %5122 = vmatmul.mubr.msk.f32.gmra.mxu0 %vm715_vm0, %v6225_v29  ;;  %5162 = vmatmul.mubr.msk.f32.gmra.mxu1 %vm715_vm0, %v6225_v29  ;;  %v510_v13 = vld [vmem:[%s6021_s10 + $0x5f8] sm:$0xff] }
 0x14f   : > { %5170 = vmatpush3.xpose.msk.msra.mxu0 %vm715_vm0, %v397_v30  ;;  %5210 = vmatpush3.xpose.msk.msra.mxu1 %vm715_vm0, %v429_v31  ;;  %v462_v30 = vld [vmem:[%s6021_s10 + $0x478] sm:$0xff] }
 0x150   : > { %5123 = vmatprep.mubr.msk.f32.mxu0 %vm715_vm0, %v6246_v33  ;;  %5163 = vmatprep.mubr.msk.f32.mxu1 %vm715_vm0, %v6246_v33  ;;  %v494_v31 = vld [vmem:[%s6021_s10 + $0x578] sm:$0xff] }
 0x151   : > { %5171 = vmatprep.subr.msk.mxu0 %vm715_vm0, %v412_v12  ;;  %5211 = vmatprep.subr.msk.mxu1 %vm715_vm0, %v444_v32  ;;  %v477_v12 = vld [vmem:[%s6021_s10 + $0x4f0] sm:$0xff] }
 0x152   : > { %5124 = vmatmul.mubr.msk.f32.gmra.mxu0 %vm715_vm0, %v6246_v33  ;;  %5164 = vmatmul.mubr.msk.f32.gmra.mxu1 %vm715_vm0, %v6246_v33  ;;  %v509_v32 = vld [vmem:[%s6021_s10 + $0x5f0] sm:$0xff] }
 0x153   : > { %5172 = vmatpush3.xpose.msk.msra.mxu0 %vm715_vm0, %v396_v34  ;;  %5212 = vmatpush3.xpose.msk.msra.mxu1 %vm715_vm0, %v428_v20  ;;  %v461_v34 = vld [vmem:[%s6021_s10 + $0x470] sm:$0xff] }
 0x154   : > { %5125 = vmatprep.mubr.msk.f32.mxu0 %vm715_vm0, %v6267_v36  ;;  %5165 = vmatprep.mubr.msk.f32.mxu1 %vm715_vm0, %v6267_v36  ;;  %v493_v20 = vld [vmem:[%s6021_s10 + $0x570] sm:$0xff] }
 0x155   : > { %5173 = vmatprep.subr.msk.mxu0 %vm715_vm0, %v411_v35  ;;  %5213 = vmatprep.subr.msk.mxu1 %vm715_vm0, %v443_v0  ;;  %v476_v35 = vld [vmem:[%s6021_s10 + $0x4e8] sm:$0xff] }
 0x156   : > { %5126 = vmatmul.mubr.msk.f32.gmra.mxu0 %vm715_vm0, %v6267_v36  ;;  %5166 = vmatmul.mubr.msk.f32.gmra.mxu1 %vm715_vm0, %v6267_v36  ;;  %v508_v0 = vld [vmem:[%s6021_s10 + $0x5e8] sm:$0xff] }
 0x157   : > { %5174 = vmatpush3.xpose.msk.msra.mxu0 %vm715_vm0, %v395_v37  ;;  %5214 = vmatpush3.xpose.msk.msra.mxu1 %vm715_vm0, %v427_v38  ;;  %v460_v37 = vld [vmem:[%s6021_s10 + $0x468] sm:$0xff] }
 0x158   : > { %5175 = vmatprep.subr.msk.mxu0 %vm715_vm0, %v410_v39  ;;  %5215 = vmatprep.subr.msk.mxu1 %vm715_vm0, %v442_v40  ;;  %v492_v38 = vld [vmem:[%s6021_s10 + $0x568] sm:$0xff]  ;;  %v475_v39 = vld [vmem:[%s6021_s10 + $0x4e0] sm:$0xff] }
 0x159   : > { %5199 = vmatprep.mubr.msk.f32.mxu0 %vm715_vm0, %v6212_v27  ;;  %5239 = vmatprep.mubr.msk.f32.mxu1 %vm715_vm0, %v6212_v27  ;;  %v507_v40 = vld [vmem:[%s6021_s10 + $0x5e0] sm:$0xff] }
 0x15b   : > { %5176 = vmatpush3.xpose.msk.msra.mxu0 %vm715_vm0, %v394_v41  ;;  %5216 = vmatpush3.xpose.msk.msra.mxu1 %vm715_vm0, %v426_v42  ;;  %v459_v41 = vld [vmem:[%s6021_s10 + $0x460] sm:$0xff] }
 0x15c   : > { %5177 = vmatprep.subr.msk.mxu0 %vm715_vm0, %v409_v43  ;;  %5217 = vmatprep.subr.msk.mxu1 %vm715_vm0, %v441_v44  ;;  %v491_v42 = vld [vmem:[%s6021_s10 + $0x560] sm:$0xff]  ;;  %v474_v43 = vld [vmem:[%s6021_s10 + $0x4d8] sm:$0xff] }
 0x15d   : > { %v506_v44 = vld [vmem:[%s6021_s10 + $0x5d8] sm:$0xff] }
 0x15f   : > { %5178 = vmatpush3.xpose.msk.msra.mxu0 %vm715_vm0, %v393_v45  ;;  %5218 = vmatpush3.xpose.msk.msra.mxu1 %vm715_vm0, %v425_v46  ;;  %v458_v45 = vld [vmem:[%s6021_s10 + $0x458] sm:$0xff] }
 0x160   : > { %5179 = vmatprep.subr.msk.mxu0 %vm715_vm0, %v408_v47  ;;  %5219 = vmatprep.subr.msk.mxu1 %vm715_vm0, %v440_v48  ;;  %v490_v46 = vld [vmem:[%s6021_s10 + $0x558] sm:$0xff]  ;;  %v473_v47 = vld [vmem:[%s6021_s10 + $0x4d0] sm:$0xff] }
 0x161   : > { %v505_v48 = vld [vmem:[%s6021_s10 + $0x5d0] sm:$0xff] }
 0x163   : > { %5180 = vmatpush3.xpose.msk.msra.mxu0 %vm715_vm0, %v392_v49  ;;  %5220 = vmatpush3.xpose.msk.msra.mxu1 %vm715_vm0, %v424_v50  ;;  %v457_v49 = vld [vmem:[%s6021_s10 + $0x450] sm:$0xff] }
 0x164   : > { %5181 = vmatprep.subr.msk.mxu0 %vm715_vm0, %v407_v51  ;;  %5221 = vmatprep.subr.msk.mxu1 %vm715_vm0, %v439_v52  ;;  %v489_v50 = vld [vmem:[%s6021_s10 + $0x550] sm:$0xff]  ;;  %v472_v51 = vld [vmem:[%s6021_s10 + $0x4c8] sm:$0xff] }
 0x165   : > { %v504_v52 = vld [vmem:[%s6021_s10 + $0x5c8] sm:$0xff] }
 0x167   : > { %5182 = vmatpush3.xpose.msk.msra.mxu0 %vm715_vm0, %v391_v53  ;;  %5222 = vmatpush3.xpose.msk.msra.mxu1 %vm715_vm0, %v423_v54  ;;  %v456_v53 = vld [vmem:[%s6021_s10 + $0x448] sm:$0xff] }
 0x168   : > { %5183 = vmatprep.subr.msk.mxu0 %vm715_vm0, %v406_v55  ;;  %5223 = vmatprep.subr.msk.mxu1 %vm715_vm0, %v438_v56  ;;  %v488_v54 = vld [vmem:[%s6021_s10 + $0x548] sm:$0xff]  ;;  %v471_v55 = vld [vmem:[%s6021_s10 + $0x4c0] sm:$0xff] }
 0x169   : > { %v503_v56 = vld [vmem:[%s6021_s10 + $0x5c0] sm:$0xff] }
 0x16b   : > { %5184 = vmatpush3.xpose.msk.msra.mxu0 %vm715_vm0, %v390_v57  ;;  %5224 = vmatpush3.xpose.msk.msra.mxu1 %vm715_vm0, %v422_v58  ;;  %v455_v57 = vld [vmem:[%s6021_s10 + $0x440] sm:$0xff] }
 0x16c   : > { %5185 = vmatprep.subr.msk.mxu0 %vm715_vm0, %v405_v59  ;;  %5225 = vmatprep.subr.msk.mxu1 %vm715_vm0, %v437_v60  ;;  %v487_v58 = vld [vmem:[%s6021_s10 + $0x540] sm:$0xff]  ;;  %v470_v59 = vld [vmem:[%s6021_s10 + $0x4b8] sm:$0xff] }
 0x16d   : > { %v502_v60 = vld [vmem:[%s6021_s10 + $0x5b8] sm:$0xff] }
 0x16f   : > { %5186 = vmatpush3.xpose.msk.msra.mxu0 %vm715_vm0, %v389_v61  ;;  %5226 = vmatpush3.xpose.msk.msra.mxu1 %vm715_vm0, %v421_v62  ;;  %v454_v61 = vld [vmem:[%s6021_s10 + $0x438] sm:$0xff] }
 0x170   : > { %5187 = vmatprep.subr.msk.mxu0 %vm715_vm0, %v404_v63  ;;  %5227 = vmatprep.subr.msk.mxu1 %vm715_vm0, %v436_v1  ;;  %v486_v62 = vld [vmem:[%s6021_s10 + $0x538] sm:$0xff]  ;;  %v469_v63 = vld [vmem:[%s6021_s10 + $0x4b0] sm:$0xff] }
 0x171   : > { %v501_v1 = vld [vmem:[%s6021_s10 + $0x5b0] sm:$0xff] }
 0x173   : > { %5188 = vmatpush3.xpose.msk.msra.mxu0 %vm715_vm0, %v388_v2  ;;  %5228 = vmatpush3.xpose.msk.msra.mxu1 %vm715_vm0, %v420_v3  ;;  %v453_v2 = vld [vmem:[%s6021_s10 + $0x430] sm:$0xff] }
 0x174   : > { %5189 = vmatprep.subr.msk.mxu0 %vm715_vm0, %v403_v4  ;;  %5229 = vmatprep.subr.msk.mxu1 %vm715_vm0, %v435_v5  ;;  %v485_v3 = vld [vmem:[%s6021_s10 + $0x530] sm:$0xff]  ;;  %v468_v4 = vld [vmem:[%s6021_s10 + $0x4a8] sm:$0xff] }
 0x175   : > { %v500_v5 = vld [vmem:[%s6021_s10 + $0x5a8] sm:$0xff] }
 0x177   : > { %5190 = vmatpush3.xpose.msk.msra.mxu0 %vm715_vm0, %v387_v6  ;;  %5230 = vmatpush3.xpose.msk.msra.mxu1 %vm715_vm0, %v419_v8  ;;  %v452_v6 = vld [vmem:[%s6021_s10 + $0x428] sm:$0xff] }
 0x178   : > { %5191 = vmatprep.subr.msk.mxu0 %vm715_vm0, %v402_v9  ;;  %5231 = vmatprep.subr.msk.mxu1 %vm715_vm0, %v434_v10  ;;  %v484_v8 = vld [vmem:[%s6021_s10 + $0x528] sm:$0xff]  ;;  %v467_v9 = vld [vmem:[%s6021_s10 + $0x4a0] sm:$0xff] }
 0x179   : > { %v499_v10 = vld [vmem:[%s6021_s10 + $0x5a0] sm:$0xff] }
 0x17b   : > { %5192 = vmatpush3.xpose.msk.msra.mxu0 %vm715_vm0, %v386_v11  ;;  %5232 = vmatpush3.xpose.msk.msra.mxu1 %vm715_vm0, %v418_v14  ;;  %v6503_v11 = vpop.f32.mrf.mxu0  ;;  %v6505_v14 = vpop.f32.mrf.mxu1 }
 0x17c   : > { %5193 = vmatprep.subr.msk.mxu0 %vm715_vm0, %v401_v15  ;;  %5233 = vmatprep.subr.msk.mxu1 %vm715_vm0, %v433_v16  ;;  %v451_v15 = vld [vmem:[%s6021_s10 + $0x420] sm:$0xff] }
 0x17d   : > { %v483_v16 = vld [vmem:[%s6021_s10 + $0x520] sm:$0xff] }
 0x17f   : > { %5194 = vmatpush3.xpose.msk.msra.mxu0 %vm715_vm0, %v385_v17  ;;  %5234 = vmatpush3.xpose.msk.msra.mxu1 %vm715_vm0, %v417_v18  ;;  %v466_v17 = vld [vmem:[%s6021_s10 + $0x498] sm:$0xff] }
 0x180   : > { %5195 = vmatprep.subr.msk.mxu0 %vm715_vm0, %v400_v19  ;;  %5235 = vmatprep.subr.msk.mxu1 %vm715_vm0, %v432_v21  ;;  %v498_v18 = vld [vmem:[%s6021_s10 + $0x598] sm:$0xff]  ;;  %v6515_v19 = vpop.f32.mrf.mxu0  ;;  %v6517_v21 = vpop.f32.mrf.mxu1 }
 0x183   : > { %5196 = vmatpush3.xpose.msk.msra.mxu0 %vm715_vm0, %v384_v22  ;;  %5236 = vmatpush3.xpose.msk.msra.mxu1 %vm715_vm0, %v416_v23  ;;  %v6521_v22 = vpop.f32.mrf.mxu0  ;;  %v6523_v23 = vpop.f32.mrf.mxu1 }
 0x184   : > { %5197 = vmatprep.subr.msk.mxu0 %vm715_vm0, %v399_v24  ;;  %5237 = vmatprep.subr.msk.mxu1 %vm715_vm0, %v431_v25  ;;  %v450_v24 = vld [vmem:[%s6021_s10 + $0x418] sm:$0xff] }
 0x185   : > { %v482_v25 = vld [vmem:[%s6021_s10 + $0x518] sm:$0xff] }
 0x187   : > { %5198 = vmatpush3.xpose.msk.msra.mxu0 %vm715_vm0, %v383_v7  ;;  %5238 = vmatpush3.xpose.msk.msra.mxu1 %vm715_vm0, %v415_v26  ;;  %v465_v7 = vld [vmem:[%s6021_s10 + $0x490] sm:$0xff] }
 0x188   : > { %5247 = vmatprep.subr.msk.mxu0 %vm715_vm0, %v478_v28  ;;  %5287 = vmatprep.subr.msk.mxu1 %vm715_vm0, %v510_v13  ;;  %v497_v26 = vld [vmem:[%s6021_s10 + $0x590] sm:$0xff]  ;;  %v6533_v28 = vpop.f32.mrf.mxu0  ;;  %v6535_v13 = vpop.f32.mrf.mxu1 }
 0x18a   : > { %5200 = vmatmul.mubr.msk.f32.vlgmr.msra.gmra.mxu0 %vm715_vm0, %v6212_v27  ;;  %5240 = vmatmul.mubr.msk.f32.vlgmr.msra.gmra.mxu1 %vm715_vm0, %v6212_v27 }
 0x18b   : > { %5248 = vmatpush3.xpose.msk.msra.mxu0 %vm715_vm0, %v462_v30  ;;  %5288 = vmatpush3.xpose.msk.msra.mxu1 %vm715_vm0, %v494_v31  ;;  %v449_v30 = vld [vmem:[%s6021_s10 + $0x410] sm:$0xff] }
 0x18c   : > { %5201 = vmatprep.mubr.msk.f32.mxu0 %vm715_vm0, %v6225_v29  ;;  %5241 = vmatprep.mubr.msk.f32.mxu1 %vm715_vm0, %v6225_v29  ;;  %v481_v31 = vld [vmem:[%s6021_s10 + $0x510] sm:$0xff] }
 0x18d   : > { %5249 = vmatprep.subr.msk.mxu0 %vm715_vm0, %v477_v12  ;;  %5289 = vmatprep.subr.msk.mxu1 %vm715_vm0, %v509_v32  ;;  %v464_v12 = vld [vmem:[%s6021_s10 + $0x488] sm:$0xff] }
 0x18e   : > { %5202 = vmatmul.mubr.msk.f32.gmra.mxu0 %vm715_vm0, %v6225_v29  ;;  %5242 = vmatmul.mubr.msk.f32.gmra.mxu1 %vm715_vm0, %v6225_v29  ;;  %v496_v32 = vld [vmem:[%s6021_s10 + $0x588] sm:$0xff] }
 0x18f   : > { %5250 = vmatpush3.xpose.msk.msra.mxu0 %vm715_vm0, %v461_v34  ;;  %5290 = vmatpush3.xpose.msk.msra.mxu1 %vm715_vm0, %v493_v20  ;;  %v6545_v34 = vpop.f32.mrf.mxu0  ;;  %v6547_v20 = vpop.f32.mrf.mxu1 }
 0x190   : > { %5203 = vmatprep.mubr.msk.f32.mxu0 %vm715_vm0, %v6246_v33  ;;  %5243 = vmatprep.mubr.msk.f32.mxu1 %vm715_vm0, %v6246_v33 }
 0x191   : > { %5251 = vmatprep.subr.msk.mxu0 %vm715_vm0, %v476_v35  ;;  %5291 = vmatprep.subr.msk.mxu1 %vm715_vm0, %v508_v0  ;;  %v448_v35 = vld [vmem:[%s6021_s10 + $0x408] sm:$0xff] }
 0x192   : > { %5204 = vmatmul.mubr.msk.f32.gmra.mxu0 %vm715_vm0, %v6246_v33  ;;  %5244 = vmatmul.mubr.msk.f32.gmra.mxu1 %vm715_vm0, %v6246_v33  ;;  %v480_v0 = vld [vmem:[%s6021_s10 + $0x508] sm:$0xff] }
 0x193   : > { %5252 = vmatpush3.xpose.msk.msra.mxu0 %vm715_vm0, %v460_v37  ;;  %5292 = vmatpush3.xpose.msk.msra.mxu1 %vm715_vm0, %v492_v38  ;;  %v463_v37 = vld [vmem:[%s6021_s10 + $0x480] sm:$0xff] }
 0x194   : > { %5205 = vmatprep.mubr.msk.f32.mxu0 %vm715_vm0, %v6267_v36  ;;  %5245 = vmatprep.mubr.msk.f32.mxu1 %vm715_vm0, %v6267_v36  ;;  %v495_v38 = vld [vmem:[%s6021_s10 + $0x580] sm:$0xff] }
 0x195   : > { %5253 = vmatprep.subr.msk.mxu0 %vm715_vm0, %v475_v39  ;;  %5293 = vmatprep.subr.msk.mxu1 %vm715_vm0, %v507_v40  ;;  %v6557_v39 = vpop.f32.mrf.mxu0  ;;  %v6559_v40 = vpop.f32.mrf.mxu1 }
 0x196   : > { %5206 = vmatmul.mubr.msk.f32.gmra.mxu0 %vm715_vm0, %v6267_v36  ;;  %5246 = vmatmul.mubr.msk.f32.gmra.mxu1 %vm715_vm0, %v6267_v36 }
 0x197   : > { %5254 = vmatpush3.xpose.msk.msra.mxu0 %vm715_vm0, %v459_v41  ;;  %5294 = vmatpush3.xpose.msk.msra.mxu1 %vm715_vm0, %v491_v42  ;;  %v447_v41 = vld [vmem:[%s6021_s10 + $0x400] sm:$0xff] }
 0x198   : > { %5255 = vmatprep.subr.msk.mxu0 %vm715_vm0, %v474_v43  ;;  %5295 = vmatprep.subr.msk.mxu1 %vm715_vm0, %v506_v44  ;;  %v479_v42 = vld [vmem:[%s6021_s10 + $0x500] sm:$0xff]  ;;  %v6567_v43 = vpop.f32.mrf.mxu0  ;;  %v6569_v44 = vpop.f32.mrf.mxu1  ;;  %s5454_s10 = smov [#allocation2]  }
 0x199   : > { %5279 = vmatprep.mubr.msk.f32.mxu0 %vm715_vm0, %v6212_v27  ;;  %5319 = vmatprep.mubr.msk.f32.mxu1 %vm715_vm0, %v6212_v27  ;;  %s5390_s13 = sshll.u32 %s5454_s10, 4  ;;  %s5391_s13 = int_to_ptr.vmem [resolvable:$false] %s5390_s13 }
 0x19a   : > { %s5392_s25 = scalar_lea.vmem %s5391_s13, 768  ;;  %p5393_p0 = scmp.lt.s32.totalorder %s4281_s26, %s5391_s13 }
 0x19b   : > { %5256 = vmatpush3.xpose.msk.msra.mxu0 %vm715_vm0, %v458_v45  ;;  %5296 = vmatpush3.xpose.msk.msra.mxu1 %vm715_vm0, %v490_v46  ;;  %v6579_v45 = vpop.f32.mrf.mxu0  ;;  %v6581_v46 = vpop.f32.mrf.mxu1  ;;  %p5394_p1 = scmp.lt.s32.totalorder %s5392_s25, %s5386_s12 }
 0x19c   : > { %5257 = vmatprep.subr.msk.mxu0 %vm715_vm0, %v473_v47  ;;  %5297 = vmatprep.subr.msk.mxu1 %vm715_vm0, %v505_v48 }
 0x19d   : > { %v6583_v47 = vpop.f32.mrf.mxu0  ;;  %v6585_v48 = vpop.f32.mrf.mxu1  ;;  %p5395_p2 = por %p5394_p1, %p5393_p0 }
 0x19f   : > { %5258 = vmatpush3.xpose.msk.msra.mxu0 %vm715_vm0, %v457_v49  ;;  %5298 = vmatpush3.xpose.msk.msra.mxu1 %vm715_vm0, %v489_v50  ;;  %v6597_v49 = vpop.f32.mrf.mxu1  ;;  %p5396_p3 = pnand %p5395_p2, %p5389_p13 }
 0x1a0   : > { %5259 = vmatprep.subr.msk.mxu0 %vm715_vm0, %v472_v51  ;;  %5299 = vmatprep.subr.msk.mxu1 %vm715_vm0, %v504_v52 }
 0x1a1   : > { %v6609_v50 = vpop.f32.mrf.mxu1 }
 0x1a3   : > { %5260 = vmatpush3.xpose.msk.msra.mxu0 %vm715_vm0, %v456_v53  ;;  %5300 = vmatpush3.xpose.msk.msra.mxu1 %vm715_vm0, %v488_v54  ;;  %v6617_v52 = vpop.f32.mrf.mxu1  ;;  %v7032_v54 = vmov 0.0  }
 0x1a4   : > { %5261 = vmatprep.subr.msk.mxu0 %vm715_vm0, %v471_v55  ;;  %5301 = vmatprep.subr.msk.mxu1 %vm715_vm0, %v503_v56 }
 0x1a5   : > { %v6621_v53 = vpop.f32.mrf.mxu1 }
 0x1a7   : > { %5262 = vmatpush3.xpose.msk.msra.mxu0 %vm715_vm0, %v455_v57  ;;  %5302 = vmatpush3.xpose.msk.msra.mxu1 %vm715_vm0, %v487_v58  ;;  %v6627_v56 = vpop.f32.mrf.mxu1 }
 0x1a8   : > { %5263 = vmatprep.subr.msk.mxu0 %vm715_vm0, %v470_v59  ;;  %5303 = vmatprep.subr.msk.mxu1 %vm715_vm0, %v502_v60 }
 0x1ab   : > { %5264 = vmatpush3.xpose.msk.msra.mxu0 %vm715_vm0, %v454_v61  ;;  %5304 = vmatpush3.xpose.msk.msra.mxu1 %vm715_vm0, %v486_v62 }
 0x1ac   : > { %5265 = vmatprep.subr.msk.mxu0 %vm715_vm0, %v469_v63  ;;  %5305 = vmatprep.subr.msk.mxu1 %vm715_vm0, %v501_v1 }
 0x1af   : > { %5266 = vmatpush3.xpose.msk.msra.mxu0 %vm715_vm0, %v453_v2  ;;  %5306 = vmatpush3.xpose.msk.msra.mxu1 %vm715_vm0, %v485_v3 }
 0x1b0   : > { %5267 = vmatprep.subr.msk.mxu0 %vm715_vm0, %v468_v4  ;;  %5307 = vmatprep.subr.msk.mxu1 %vm715_vm0, %v500_v5 }
 0x1b3   : > { %5268 = vmatpush3.xpose.msk.msra.mxu0 %vm715_vm0, %v452_v6  ;;  %5308 = vmatpush3.xpose.msk.msra.mxu1 %vm715_vm0, %v484_v8 }
 0x1b4   : > { %5269 = vmatprep.subr.msk.mxu0 %vm715_vm0, %v467_v9  ;;  %5309 = vmatprep.subr.msk.mxu1 %vm715_vm0, %v499_v10 }
 0x1b7   : > { %5270 = vmatpush3.xpose.msk.msra.mxu0 %vm715_vm0, %v451_v15  ;;  %5310 = vmatpush3.xpose.msk.msra.mxu1 %vm715_vm0, %v483_v16 }
 0x1b8   : > { %5271 = vmatprep.subr.msk.mxu0 %vm715_vm0, %v466_v17  ;;  %5311 = vmatprep.subr.msk.mxu1 %vm715_vm0, %v498_v18 }
 0x1bb   : > { %5272 = vmatpush3.xpose.msk.msra.mxu0 %vm715_vm0, %v450_v24  ;;  %5312 = vmatpush3.xpose.msk.msra.mxu1 %vm715_vm0, %v482_v25 }
 0x1bc   : > { %5273 = vmatprep.subr.msk.mxu0 %vm715_vm0, %v465_v7  ;;  %5313 = vmatprep.subr.msk.mxu1 %vm715_vm0, %v497_v26 }
 0x1bf   : > { %5274 = vmatpush3.xpose.msk.msra.mxu0 %vm715_vm0, %v449_v30  ;;  %5314 = vmatpush3.xpose.msk.msra.mxu1 %vm715_vm0, %v481_v31 }
 0x1c0   : > { %5275 = vmatprep.subr.msk.mxu0 %vm715_vm0, %v464_v12  ;;  %5315 = vmatprep.subr.msk.mxu1 %vm715_vm0, %v496_v32 }
 0x1c3   : > { %5276 = vmatpush3.xpose.msk.msra.mxu0 %vm715_vm0, %v448_v35  ;;  %5316 = vmatpush3.xpose.msk.msra.mxu1 %vm715_vm0, %v480_v0 }
 0x1c4   : > { %5277 = vmatprep.subr.msk.mxu0 %vm715_vm0, %v463_v37  ;;  %5317 = vmatprep.subr.msk.mxu1 %vm715_vm0, %v495_v38  ;;  %v6669_v38 = vpop.permute.xlu1 %2968 }
 0x1c7   : > { %5278 = vmatpush3.xpose.msk.msra.mxu0 %vm715_vm0, %v447_v41  ;;  %5318 = vmatpush3.xpose.msk.msra.mxu1 %vm715_vm0, %v479_v42 }
 0x1ca   : > { %5280 = vmatmul.mubr.msk.f32.vlgmr.msra.gmra.mxu0 %vm715_vm0, %v6212_v27  ;;  %5320 = vmatmul.mubr.msk.f32.vlgmr.msra.gmra.mxu1 %vm715_vm0, %v6212_v27  ;;  %v6595_v27 = vpop.f32.mrf.mxu0 }
 0x1cb   : > { %5281 = vmatprep.mubr.msk.f32.mxu0 %vm715_vm0, %v6225_v29  ;;  %5321 = vmatprep.mubr.msk.f32.mxu1 %vm715_vm0, %v6225_v29 }
 0x1ce   : > { %5282 = vmatmul.mubr.msk.f32.gmra.mxu0 %vm715_vm0, %v6225_v29  ;;  %5322 = vmatmul.mubr.msk.f32.gmra.mxu1 %vm715_vm0, %v6225_v29  ;;  %v6607_v29 = vpop.f32.mrf.mxu0 }
 0x1cf   : > { %5283 = vmatprep.mubr.msk.f32.mxu0 %vm715_vm0, %v6246_v33  ;;  %5323 = vmatprep.mubr.msk.f32.mxu1 %vm715_vm0, %v6246_v33 }
 0x1d0   : > { %v6615_v51 = vpop.f32.mrf.mxu0 }
 0x1d2   : > { %5284 = vmatmul.mubr.msk.f32.gmra.mxu0 %vm715_vm0, %v6246_v33  ;;  %5324 = vmatmul.mubr.msk.f32.gmra.mxu1 %vm715_vm0, %v6246_v33  ;;  %v6619_v33 = vpop.f32.mrf.mxu0 }
 0x1d3   : > { %5285 = vmatprep.mubr.msk.f32.mxu0 %vm715_vm0, %v6267_v36  ;;  %5325 = vmatprep.mubr.msk.f32.mxu1 %vm715_vm0, %v6267_v36 }
 0x1d4   : > { %v6625_v55 = vpop.f32.mrf.mxu0 }
 0x1d6   : > { %5286 = vmatmul.mubr.msk.f32.gmra.mxu0 %vm715_vm0, %v6267_v36  ;;  %5326 = vmatmul.mubr.msk.f32.gmra.mxu1 %vm715_vm0, %v6267_v36  ;;  %v6629_v57 = vpop.f32.mrf.mxu0  ;;  %v6631_v36 = vpop.f32.mrf.mxu1 }
 0x1d7   : > { %3206 = vmatprep.mubr.f32.mxu0 %v7032_v54  ;;  %3295 = vmatprep.mubr.f32.mxu1 %v7032_v54  ;;  %v6671_v54 = vpop.permute.xlu0 %2973 }
 0x1d8   : > { %v6633_v58 = vpop.f32.mrf.mxu0  ;;  %v6635_v59 = vpop.f32.mrf.mxu1 }
 0x1da   : > { %v6637_v60 = vpop.f32.mrf.mxu0  ;;  %v6639_v61 = vpop.f32.mrf.mxu1 }
 0x1db   : > { %7036 = vst [vmem:[#allocation5_spill] sm:$0xff] %v6637_v60  ;;  %7037 = vst [vmem:[#allocation6_spill] sm:$0xff] %v6639_v61 }
 0x1dc   : > { %v6641_v62 = vpop.f32.mrf.mxu0  ;;  %v6643_v63 = vpop.f32.mrf.mxu1 }
 0x1dd   : > { %7038 = vst [vmem:[#allocation7_spill] sm:$0xff] %v6643_v63 }
 0x1de   : > { %v6645_v1 = vpop.f32.mrf.mxu0  ;;  %v6647_v2 = vpop.f32.mrf.mxu1 }
 0x1df   : > { %7039 = vst [vmem:[#allocation8_spill] sm:$0xff] %v6645_v1  ;;  %7040 = vst [vmem:[#allocation9_spill] sm:$0xff] %v6647_v2 }
 0x1e0   : > { %v6649_v3 = vpop.f32.mrf.mxu0  ;;  %v6651_v4 = vpop.f32.mrf.mxu1 }
 0x1e1   : > { %7041 = vst [vmem:[#allocation10_spill] sm:$0xff] %v6649_v3  ;;  %7042 = vst [vmem:[#allocation11_spill] sm:$0xff] %v6651_v4 }
 0x1e2   : > { %v6653_v5 = vpop.f32.mrf.mxu0  ;;  %v6655_v6 = vpop.f32.mrf.mxu1 }
 0x1e3   : > { %7043 = vst [vmem:[#allocation12_spill] sm:$0xff] %v6653_v5  ;;  %7044 = vst [vmem:[#allocation13_spill] sm:$0xff] %v6655_v6 }
 0x1e4   : > { %v6657_v8 = vpop.f32.mrf.mxu0  ;;  %v6659_v9 = vpop.f32.mrf.mxu1 }
 0x1e6   : > { %v6661_v10 = vpop.f32.mrf.mxu0  ;;  %v6663_v15 = vpop.f32.mrf.mxu1 }
 0x1e8   : > { %v6665_v16 = vpop.f32.mrf.mxu0  ;;  %v6667_v17 = vpop.f32.mrf.mxu1 }
 0x1e9   : > { %7045 = vst [vmem:[#allocation14_spill] sm:$0xff] %v6665_v16  ;;  %7046 = vst [vmem:[#allocation15_spill] sm:$0xff] %v6667_v17 }
 0x20a   : > { %v2484_v18 = vpop.f32.mrf.mxu0  ;;  %v2573_v24 = vpop.f32.mrf.mxu1 }
 0x20c   : > { %v2486_v25 = vpop.f32.mrf.mxu0  ;;  %v2575_v7 = vpop.f32.mrf.mxu1 }
 0x20d   : > { %v2487_v17 = vadd.f32 %v2486_v25, %v6515_v19  ;;  %v2576_v16 = vadd.f32 %v2575_v7, %v6517_v21  ;;  %v6689_v25 = vpop.permute.xlu1 %2963 }
 0x20e   : > { %v2490_v26 = vpop.f32.mrf.mxu0  ;;  %v2579_v30 = vpop.f32.mrf.mxu1 }
 0x20f   : > { %v2580_v19 = vadd.f32 %v2579_v30, %v6523_v23 }
 0x210   : > { %v2492_v31 = vpop.f32.mrf.mxu0  ;;  %v2581_v12 = vpop.f32.mrf.mxu1 }
 0x211   : > { %v2493_v63 = vadd.f32 %v2492_v31, %v6533_v28 }
 0x212   : > { %v2496_v32 = vpop.f32.mrf.mxu0  ;;  %v2585_v35 = vpop.f32.mrf.mxu1 }
 0x213   : > { %v2497_v4 = vadd.f32 %v2496_v32, %v6545_v34  ;;  %v2586_v3 = vadd.f32 %v2585_v35, %v6547_v20 }
 0x214   : > { %v2498_v0 = vpop.f32.mrf.mxu0  ;;  %v2587_v37 = vpop.f32.mrf.mxu1 }
 0x215   : > { %v2499_v61 = vadd.f32 %v2498_v0, %v6557_v39  ;;  %v2588_v60 = vadd.f32 %v2587_v37, %v6559_v40  ;;  %v2582_v39 = vadd.f32 %v2581_v12, %v6535_v13  ;;  %v3000_v23 = vadd.f32 %v6669_v38, %v2497_v4 }
 0x216   : > { %v2502_v41 = vpop.f32.mrf.mxu0  ;;  %v2591_v42 = vpop.f32.mrf.mxu1 }
 0x217   : > { %v2503_v2 = vadd.f32 %v2502_v41, %v6567_v43  ;;  %v2592_v1 = vadd.f32 %v2591_v42, %v6569_v44  ;;  %v2491_v44 = vadd.f32 %v2490_v26, %v6521_v22  ;;  %v3001_v20 = vadd.f32 %v6669_v38, %v2499_v61 }
 0x218   : > { %v2504_v6 = vpop.f32.mrf.mxu0  ;;  %v2593_v5 = vpop.f32.mrf.mxu1  ;;  %v3003_v28 = vadd.f32 %v6669_v38, %v2588_v60  ;;  %v2574_v22 = vadd.f32 %v2573_v24, %v6505_v14  ;;  %v2991_v61 = vadd.f32 %v6689_v25, %v2582_v39  ;;  %v6716_v39 = vld [vmem:[%s7028_s3] sm:$0xff] }
 0x219   : > { %v2505_v40 = vadd.f32 %v2504_v6, %v6579_v45  ;;  %v2594_v43 = vadd.f32 %v2593_v5, %v6581_v46  ;;  %v3012_v21 = vadd.f32 %v6671_v54, %v2503_v2  ;;  %v3014_v34 = vadd.f32 %v6671_v54, %v2592_v1  ;;  %v6699_v5 = vpop.permute.xlu0 %2958 }
 0x21a   : > { %v2485_v46 = vadd.f32 %v2484_v18, %v6503_v11  ;;  %v3002_v2 = vadd.f32 %v6669_v38, %v2586_v3  ;;  %v2989_v1 = vadd.f32 %v6689_v25, %v2493_v63  ;;  %v2988_v30 = vadd.f32 %v6689_v25, %v2491_v44  ;;  %v6738_v44 = vld [vmem:[%s7028_s3 + $0x10] sm:$0xff] }
 0x21b   : > { %v3013_v13 = vadd.f32 %v6671_v54, %v2505_v40  ;;  %v3015_v45 = vadd.f32 %v6671_v54, %v2594_v43  ;;  %v3060_v7 = vmax.f32 %v3012_v21, 0.0  ;;  %v3062_v26 = vmax.f32 %v3014_v34, 0.0  ;;  %v6727_v43 = vld [vmem:[%s7028_s3 + $0x8] sm:$0xff]  ;;  %v5382_v34 = vld [vmem:[%s7030_s5 + $0x18] sm:$0x1] }
 0x21c   : > { %v2990_v11 = vadd.f32 %v6689_v25, %v2580_v19  ;;  %v2977_v14 = vadd.f32 %v6699_v5, %v2487_v17  ;;  %v2979_v4 = vadd.f32 %v6699_v5, %v2576_v16  ;;  %v3049_v18 = vmax.f32 %v3001_v20, 0.0  ;;  %v6749_v19 = vld [vmem:[%s7028_s3 + $0x18] sm:$0x1]  ;;  %v5383_v20 = vld [vmem:[%s7030_s5 + $0x10] sm:$0xff] }
 0x21d   : > { %v3061_v6 = vmax.f32 %v3013_v13, 0.0  ;;  %v3063_v60 = vmax.f32 %v3015_v45, 0.0  ;;  %v3051_v3 = vmax.f32 %v3003_v28, 0.0  ;;  %v3048_v63 = vmax.f32 %v3000_v23, 0.0  ;;  %v5384_v28 = vld [vmem:[%s7030_s5 + $0x8] sm:$0xff]  ;;  %v5385_v13 = vld [vmem:[%s7030_s5] sm:$0xff] }
 0x21e   : > { %v3050_v24 = vmax.f32 %v3002_v2, 0.0  ;;  %v2976_v31 = vadd.f32 %v6699_v5, %v2485_v46  ;;  %v2978_v12 = vadd.f32 %v6699_v5, %v2574_v22  ;;  %v3037_v32 = vmax.f32 %v2989_v1, 0.0 }
 0x21f   : > { %4789 = vmatprep.subr.msk.mxu0 %vm3105_vm1, %v3061_v6  ;;  %4795 = vmatprep.subr.msk.mxu1 %vm3105_vm1, %v3063_v60  ;;  %v3039_v17 = vmax.f32 %v2991_v61, 0.0  ;;  %v3036_v16 = vmax.f32 %v2988_v30, 0.0  ;;  %v3038_v35 = vmax.f32 %v2990_v11, 0.0  ;;  %v3025_v0 = vmax.f32 %v2977_v14, 0.0 }
 0x220   : > { %4790 = vmatpush1.msk.msra.mxu0 %vm3105_vm1, %v3060_v7  ;;  %4796 = vmatpush1.msk.msra.mxu1 %vm3105_vm1, %v3062_v26  ;;  %v3027_v37 = vmax.f32 %v2979_v4, 0.0  ;;  %v3024_v41 = vmax.f32 %v2976_v31, 0.0  ;;  %v3026_v42 = vmax.f32 %v2978_v12, 0.0  ;;  %v7047_v40 = vmov 0.0  }
 0x221   : > { %3168 = vmatprep.subr.mxu0 %v3049_v18  ;;  %3257 = vmatprep.subr.mxu1 %v3051_v3  ;;  %v5451_v21 = vmov 1  }
 0x222   : > { %3169 = vmatpush1.msra.mxu0 %v3048_v63  ;;  %3258 = vmatpush1.msra.mxu1 %v3050_v24 }
 0x223   : > { %3170 = vmatprep.subr.mxu0 %v3037_v32  ;;  %3259 = vmatprep.subr.mxu1 %v3039_v17 }
 0x224   : > { %3171 = vmatpush1.msra.mxu0 %v3036_v16  ;;  %3260 = vmatpush1.msra.mxu1 %v3038_v35 }
 0x225   : > { %3172 = vmatprep.subr.mxu0 %v3025_v0  ;;  %3261 = vmatprep.subr.mxu1 %v3027_v37 }
 0x226   : > { %3173 = vmatpush1.msra.mxu0 %v3024_v41  ;;  %3262 = vmatpush1.msra.mxu1 %v3026_v42 }
 0x227   : > { %4791 = vmatmul.mubr.msk.f32.vlgmr.msra.gmra.mxu0 %vm3092_vm2, %v6716_v39  ;;  %4797 = vmatmul.mubr.msk.f32.vlgmr.msra.gmra.mxu1 %vm3092_vm2, %v6716_v39 }
 0x228   : > { %3212 = vmatprep.mubr.f32.mxu0 %v7047_v40  ;;  %3301 = vmatprep.mubr.f32.mxu1 %v7047_v40 }
 0x229   : > { %5375 = vset.pattern.permute.xlu1 %v5451_v21  ;;  %5376 = vset.pattern.permute.xlu0 %v5451_v21 }
 0x22a   : > { %3089 = vperm.xlu1 %5375, %v5382_v34   ;;  %3085 = vperm.xlu0 %5376, %v5383_v20  }
 0x22b   : > { %4792 = vmatmul.mubr.msk.f32.gmra.mxu0 %vm3092_vm2, %v6727_v43  ;;  %4798 = vmatmul.mubr.msk.f32.gmra.mxu1 %vm3092_vm2, %v6727_v43 }
 0x22c   : > { %3218 = vmatprep.mubr.f32.mxu0 %v7047_v40  ;;  %3307 = vmatprep.mubr.f32.mxu1 %v7047_v40 }
 0x22e   : > { %3081 = vperm.xlu1 %5375, %v5384_v28  }
 0x22f   : > { %4793 = vmatmul.mubr.msk.f32.gmra.mxu0 %vm3092_vm2, %v6738_v44  ;;  %4799 = vmatmul.mubr.msk.f32.gmra.mxu1 %vm3092_vm2, %v6738_v44 }
 0x230   : > { %3224 = vmatprep.mubr.f32.mxu0 %v7047_v40  ;;  %3313 = vmatprep.mubr.f32.mxu1 %v7047_v40 }
 0x232   : > { %3077 = vperm.xlu1 %5375, %v5385_v13  }
 0x233   : > { %4794 = vmatmul.mubr.msk.f32.gmra.mxu0 %vm3092_vm2, %v6749_v19  ;;  %4800 = vmatmul.mubr.msk.f32.gmra.mxu1 %vm3092_vm2, %v6749_v19 }
 0x234   : > { %3384 = vmatprep.mubr.f32.mxu0 %v7047_v40  ;;  %3473 = vmatprep.mubr.f32.mxu1 %v7047_v40 }
 0x24a   : > { %v2662_v45 = vpop.f32.mrf.mxu0  ;;  %v2751_v46 = vpop.f32.mrf.mxu1 }
 0x24c   : > { %v2664_v22 = vpop.f32.mrf.mxu0  ;;  %v2753_v23 = vpop.f32.mrf.mxu1 }
 0x24d   : > { %v2665_v24 = vadd.f32 %v2664_v22, %v6595_v27  ;;  %v2754_v31 = vadd.f32 %v2753_v23, %v6597_v49 }
 0x24e   : > { %v2668_v2 = vpop.f32.mrf.mxu0  ;;  %v2757_v1 = vpop.f32.mrf.mxu1 }
 0x24f   : > { %v2758_v27 = vadd.f32 %v2757_v1, %v6609_v50 }
 0x250   : > { %v2670_v61 = vpop.f32.mrf.mxu0  ;;  %v2759_v6 = vpop.f32.mrf.mxu1 }
 0x251   : > { %v2671_v35 = vadd.f32 %v2670_v61, %v6615_v51  ;;  %v2994_v20 = vadd.f32 %v6689_v25, %v2758_v27 }
 0x252   : > { %v2674_v60 = vpop.f32.mrf.mxu0  ;;  %v2763_v7 = vpop.f32.mrf.mxu1 }
 0x253   : > { %v2675_v12 = vadd.f32 %v2674_v60, %v6619_v33  ;;  %v2764_v32 = vadd.f32 %v2763_v7, %v6621_v53  ;;  %v2993_v37 = vadd.f32 %v6689_v25, %v2671_v35  ;;  %v3042_v7 = vmax.f32 %v2994_v20, 0.0  ;;  %v7054_v20 = vld [vmem:[#allocation15_spill] sm:$0xff] }
 0x254   : > { %v2676_v26 = vpop.f32.mrf.mxu0  ;;  %v2765_v30 = vpop.f32.mrf.mxu1 }
 0x255   : > { %v2677_v4 = vadd.f32 %v2676_v26, %v6625_v55  ;;  %v2766_v18 = vadd.f32 %v2765_v30, %v6627_v56  ;;  %v2760_v55 = vadd.f32 %v2759_v6, %v6617_v52  ;;  %v3006_v50 = vadd.f32 %v6669_v38, %v2764_v32 }
 0x256   : > { %v2680_v11 = vpop.f32.mrf.mxu0  ;;  %v2769_v14 = vpop.f32.mrf.mxu1  ;;  %v3041_v61 = vmax.f32 %v2993_v37, 0.0 }
 0x257   : > { %v2681_v3 = vadd.f32 %v2680_v11, %v6629_v57  ;;  %v2770_v63 = vadd.f32 %v2769_v14, %v6631_v36  ;;  %v2669_v36 = vadd.f32 %v2668_v2, %v6607_v29  ;;  %v3005_v53 = vadd.f32 %v6669_v38, %v2677_v4 }
 0x258   : > { %v2682_v17 = vpop.f32.mrf.mxu0  ;;  %v2771_v16 = vpop.f32.mrf.mxu1  ;;  %v3007_v0 = vadd.f32 %v6669_v38, %v2766_v18  ;;  %v3004_v29 = vadd.f32 %v6669_v38, %v2675_v12  ;;  %v2995_v41 = vadd.f32 %v6689_v25, %v2760_v55  ;;  %v3054_v1 = vmax.f32 %v3006_v50, 0.0 }
 0x259   : > { %v2683_v56 = vadd.f32 %v2682_v17, %v6633_v58  ;;  %v2772_v57 = vadd.f32 %v2771_v16, %v6635_v59  ;;  %v3016_v49 = vadd.f32 %v6671_v54, %v2681_v3  ;;  %v3018_v33 = vadd.f32 %v6671_v54, %v2770_v63 }
 0x25a   : > { %v2663_v58 = vadd.f32 %v2662_v45, %v6583_v47  ;;  %v2752_v59 = vadd.f32 %v2751_v46, %v6585_v48  ;;  %v2992_v34 = vadd.f32 %v6689_v25, %v2669_v36  ;;  %v2981_v47 = vadd.f32 %v6699_v5, %v2665_v24 }
 0x25b   : > { %v3017_v51 = vadd.f32 %v6671_v54, %v2683_v56  ;;  %v3019_v52 = vadd.f32 %v6671_v54, %v2772_v57  ;;  %v3064_v28 = vmax.f32 %v3016_v49, 0.0  ;;  %v3066_v13 = vmax.f32 %v3018_v33, 0.0 }
 0x25c   : > { %v2983_v48 = vadd.f32 %v6699_v5, %v2754_v31  ;;  %v3053_v45 = vmax.f32 %v3005_v53, 0.0  ;;  %v3055_v46 = vmax.f32 %v3007_v0, 0.0  ;;  %v2980_v22 = vadd.f32 %v6699_v5, %v2663_v58  ;;  %v7048_v0 = vld [vmem:[#allocation7_spill] sm:$0xff] }
 0x25d   : > { %v3065_v42 = vmax.f32 %v3017_v51, 0.0  ;;  %v3067_v21 = vmax.f32 %v3019_v52, 0.0  ;;  %v2982_v23 = vadd.f32 %v6699_v5, %v2752_v59  ;;  %v3052_v2 = vmax.f32 %v3004_v29, 0.0  ;;  %v7049_v52 = vld [vmem:[#allocation12_spill] sm:$0xff]  ;;  %v7050_v59 = vld [vmem:[#allocation13_spill] sm:$0xff] }
 0x25e   : > { %v3043_v6 = vmax.f32 %v2995_v41, 0.0  ;;  %v3040_v60 = vmax.f32 %v2992_v34, 0.0  ;;  %v3029_v26 = vmax.f32 %v2981_v47, 0.0  ;;  %v3031_v30 = vmax.f32 %v2983_v48, 0.0  ;;  %v7051_v41 = vld [vmem:[#allocation10_spill] sm:$0xff] }
 0x25f   : > { %4801 = vmatprep.subr.msk.mxu0 %vm3105_vm1, %v3065_v42  ;;  %4807 = vmatprep.subr.msk.mxu1 %vm3105_vm1, %v3067_v21  ;;  %v3028_v11 = vmax.f32 %v2980_v22, 0.0  ;;  %v3030_v14 = vmax.f32 %v2982_v23, 0.0  ;;  %v7052_v21 = vld [vmem:[#allocation11_spill] sm:$0xff]  ;;  %v7053_v34 = vld [vmem:[#allocation14_spill] sm:$0xff] }
 0x260   : > { %4802 = vmatpush1.msk.msra.mxu0 %vm3105_vm1, %v3064_v28  ;;  %4808 = vmatpush1.msk.msra.mxu1 %vm3105_vm1, %v3066_v13  ;;  %v7055_v28 = vld [vmem:[#allocation8_spill] sm:$0xff]  ;;  %v7056_v13 = vld [vmem:[#allocation9_spill] sm:$0xff] }
 0x261   : > { %3346 = vmatprep.subr.mxu0 %v3053_v45  ;;  %3435 = vmatprep.subr.mxu1 %v3055_v46 }
 0x262   : > { %3347 = vmatpush1.msra.mxu0 %v3052_v2  ;;  %3436 = vmatpush1.msra.mxu1 %v3054_v1  ;;  %v7057_v2 = vld [vmem:[#allocation5_spill] sm:$0xff] }
 0x263   : > { %3348 = vmatprep.subr.mxu0 %v3041_v61  ;;  %3437 = vmatprep.subr.mxu1 %v3043_v6  ;;  %v7058_v61 = vld [vmem:[#allocation6_spill] sm:$0xff] }
 0x264   : > { %3349 = vmatpush1.msra.mxu0 %v3040_v60  ;;  %3438 = vmatpush1.msra.mxu1 %v3042_v7 }
 0x265   : > { %3350 = vmatprep.subr.mxu0 %v3029_v26  ;;  %3439 = vmatprep.subr.mxu1 %v3031_v30 }
 0x266   : > { %3351 = vmatpush1.msra.mxu0 %v3028_v11  ;;  %3440 = vmatpush1.msra.mxu1 %v3030_v14 }
 0x267   : > { %4803 = vmatmul.mubr.msk.f32.vlgmr.msra.gmra.mxu0 %vm3092_vm2, %v6716_v39  ;;  %4809 = vmatmul.mubr.msk.f32.vlgmr.msra.gmra.mxu1 %vm3092_vm2, %v6716_v39 }
 0x268   : > { %3390 = vmatprep.mubr.f32.mxu0 %v7047_v40  ;;  %3479 = vmatprep.mubr.f32.mxu1 %v7047_v40 }
 0x26b   : > { %4804 = vmatmul.mubr.msk.f32.gmra.mxu0 %vm3092_vm2, %v6727_v43  ;;  %4810 = vmatmul.mubr.msk.f32.gmra.mxu1 %vm3092_vm2, %v6727_v43 }
 0x26c   : > { %3396 = vmatprep.mubr.f32.mxu0 %v7047_v40  ;;  %3485 = vmatprep.mubr.f32.mxu1 %v7047_v40 }
 0x26f   : > { %4805 = vmatmul.mubr.msk.f32.gmra.mxu0 %vm3092_vm2, %v6738_v44  ;;  %4811 = vmatmul.mubr.msk.f32.gmra.mxu1 %vm3092_vm2, %v6738_v44 }
 0x270   : > { %3402 = vmatprep.mubr.f32.mxu0 %v7047_v40  ;;  %3491 = vmatprep.mubr.f32.mxu1 %v7047_v40 }
 0x273   : > { %4806 = vmatmul.mubr.msk.f32.gmra.mxu0 %vm3092_vm2, %v6749_v19  ;;  %4812 = vmatmul.mubr.msk.f32.gmra.mxu1 %vm3092_vm2, %v6749_v19 }
 0x274   : > { %3562 = vmatprep.mubr.f32.mxu0 %v7047_v40  ;;  %3651 = vmatprep.mubr.f32.mxu1 %v7047_v40 }
 0x28a   : > { %v2840_v4 = vpop.f32.mrf.mxu0  ;;  %v2929_v18 = vpop.f32.mrf.mxu1 }
 0x28b   : > { %v2841_v1 = vadd.f32 %v2840_v4, %v7057_v2  ;;  %v2930_v6 = vadd.f32 %v2929_v18, %v7058_v61 }
 0x28c   : > { %v2842_v3 = vpop.f32.mrf.mxu0  ;;  %v2931_v63 = vpop.f32.mrf.mxu1 }
 0x28d   : > { %v2843_v53 = vadd.f32 %v2842_v3, %v6641_v62  ;;  %v2932_v51 = vadd.f32 %v2931_v63, %v7048_v0 }
 0x28e   : > { %v2846_v24 = vpop.f32.mrf.mxu0  ;;  %v2935_v31 = vpop.f32.mrf.mxu1 }
 0x28f   : > { %v2936_v62 = vadd.f32 %v2935_v31, %v7056_v13  ;;  %v2985_v4 = vadd.f32 %v6699_v5, %v2843_v53  ;;  %v2987_v18 = vadd.f32 %v6699_v5, %v2932_v51 }
 0x290   : > { %v2848_v12 = vpop.f32.mrf.mxu0  ;;  %v2937_v32 = vpop.f32.mrf.mxu1 }
 0x291   : > { %v2849_v42 = vadd.f32 %v2848_v12, %v7051_v41  ;;  %v2998_v63 = vadd.f32 %v6689_v25, %v2936_v62 }
 0x292   : > { %v2852_v17 = vpop.f32.mrf.mxu0  ;;  %v2941_v16 = vpop.f32.mrf.mxu1 }
 0x293   : > { %v2853_v58 = vadd.f32 %v2852_v17, %v7049_v52  ;;  %v2942_v29 = vadd.f32 %v2941_v16, %v7050_v59  ;;  %v2997_v26 = vadd.f32 %v6689_v25, %v2849_v42 }
 0x294   : > { %v2854_v35 = vpop.f32.mrf.mxu0  ;;  %v2943_v55 = vpop.f32.mrf.mxu1 }
 0x295   : > { %v2855_v36 = vadd.f32 %v2854_v35, %v6657_v8  ;;  %v2944_v27 = vadd.f32 %v2943_v55, %v6659_v9  ;;  %v2938_v8 = vadd.f32 %v2937_v32, %v7052_v21  ;;  %v3008_v60 = vadd.f32 %v6669_v38, %v2853_v58 }
 0x296   : > { %v2858_v56 = vpop.f32.mrf.mxu0  ;;  %v2947_v57 = vpop.f32.mrf.mxu1  ;;  %v3010_v7 = vadd.f32 %v6669_v38, %v2942_v29  ;;  %v2986_v32 = vadd.f32 %v6699_v5, %v2930_v6 }
 0x297   : > { %v2859_v49 = vadd.f32 %v2858_v56, %v6661_v10  ;;  %v2948_v33 = vadd.f32 %v2947_v57, %v6663_v15  ;;  %v2847_v15 = vadd.f32 %v2846_v24, %v7055_v28  ;;  %v3009_v45 = vadd.f32 %v6669_v38, %v2855_v36 }
 0x298   : > { %v2860_v50 = vpop.f32.mrf.mxu0  ;;  %v2949_v37 = vpop.f32.mrf.mxu1  ;;  %v3011_v46 = vadd.f32 %v6669_v38, %v2944_v27  ;;  %v2999_v30 = vadd.f32 %v6689_v25, %v2938_v8  ;;  %v2984_v38 = vadd.f32 %v6699_v5, %v2841_v1  ;;  %v3056_v17 = vmax.f32 %v3008_v60, 0.0 }
 0x299   : > { %v2861_v9 = vadd.f32 %v2860_v50, %v7053_v34  ;;  %v2950_v10 = vadd.f32 %v2949_v37, %v7054_v20  ;;  %v3020_v47 = vadd.f32 %v6671_v54, %v2859_v49  ;;  %v3022_v48 = vadd.f32 %v6671_v54, %v2948_v33 }
 0x29a   : > { %v2996_v3 = vadd.f32 %v6689_v25, %v2847_v15  ;;  %v3057_v31 = vmax.f32 %v3009_v45, 0.0  ;;  %v3059_v12 = vmax.f32 %v3011_v46, 0.0  ;;  %v3058_v16 = vmax.f32 %v3010_v7, 0.0 }
 0x29b   : > { %v3021_v22 = vadd.f32 %v6671_v54, %v2861_v9  ;;  %v3023_v23 = vadd.f32 %v6671_v54, %v2950_v10  ;;  %v3068_v24 = vmax.f32 %v3020_v47, 0.0  ;;  %v3070_v54 = vmax.f32 %v3022_v48, 0.0 }
 0x29c   : > { %v3045_v25 = vmax.f32 %v2997_v26, 0.0  ;;  %v3047_v35 = vmax.f32 %v2999_v30, 0.0  ;;  %v3044_v55 = vmax.f32 %v2996_v3, 0.0  ;;  %v3046_v56 = vmax.f32 %v2998_v63, 0.0 }
 0x29d   : > { %v3069_v11 = vmax.f32 %v3021_v22, 0.0  ;;  %v3071_v14 = vmax.f32 %v3023_v23, 0.0  ;;  %v3033_v57 = vmax.f32 %v2985_v4, 0.0  ;;  %v3035_v36 = vmax.f32 %v2987_v18, 0.0 }
 0x29e   : > { %v3032_v27 = vmax.f32 %v2984_v38, 0.0  ;;  %v3034_v5 = vmax.f32 %v2986_v32, 0.0  ;;  %v6920_v32 = vld [vmem:[%s7029_s4] sm:$0x3] }
 0x29f   : > { %4813 = vmatprep.subr.msk.mxu0 %vm3105_vm1, %v3069_v11  ;;  %4819 = vmatprep.subr.msk.mxu1 %vm3105_vm1, %v3071_v14 }
 0x2a0   : > { %4814 = vmatpush1.msk.msra.mxu0 %vm3105_vm1, %v3068_v24  ;;  %4820 = vmatpush1.msk.msra.mxu1 %vm3105_vm1, %v3070_v54 }
 0x2a1   : > { %3524 = vmatprep.subr.mxu0 %v3057_v31  ;;  %3613 = vmatprep.subr.mxu1 %v3059_v12 }
 0x2a2   : > { %3525 = vmatpush1.msra.mxu0 %v3056_v17  ;;  %3614 = vmatpush1.msra.mxu1 %v3058_v16  ;;  %v3725_v17 = vld [vmem:[%s7030_s5] sm:$0x3]  ;;  %v5452_v16 = vmov 2  }
 0x2a3   : > { %3526 = vmatprep.subr.mxu0 %v3045_v25  ;;  %3615 = vmatprep.subr.mxu1 %v3047_v35 }
 0x2a4   : > { %3527 = vmatpush1.msra.mxu0 %v3044_v55  ;;  %3616 = vmatpush1.msra.mxu1 %v3046_v56 }
 0x2a5   : > { %3528 = vmatprep.subr.mxu0 %v3033_v57  ;;  %3617 = vmatprep.subr.mxu1 %v3035_v36  ;;  %v6893_v50 = vpop.permute.xlu0 %3085 }
 0x2a6   : > { %3529 = vmatpush1.msra.mxu0 %v3032_v27  ;;  %3618 = vmatpush1.msra.mxu1 %v3034_v5 }
 0x2a7   : > { %4815 = vmatmul.mubr.msk.f32.vlgmr.msra.gmra.mxu0 %vm3092_vm2, %v6716_v39  ;;  %4821 = vmatmul.mubr.msk.f32.vlgmr.msra.gmra.mxu1 %vm3092_vm2, %v6716_v39  ;;  %v6889_v39 = vpop.permute.xlu1 %3089 }
 0x2a8   : > { %3568 = vmatprep.mubr.f32.mxu0 %v7047_v40  ;;  %3657 = vmatprep.mubr.f32.mxu1 %v7047_v40 }
 0x2a9   : > { %5377 = vset.pattern.permute.xlu0 %v5452_v16 }
 0x2aa   : > { %3728 = vperm.xlu0 %5377, %v3725_v17  }
 0x2ab   : > { %4816 = vmatmul.mubr.msk.f32.gmra.mxu0 %vm3092_vm2, %v6727_v43  ;;  %4822 = vmatmul.mubr.msk.f32.gmra.mxu1 %vm3092_vm2, %v6727_v43  ;;  %v6891_v51 = vpop.permute.xlu1 %3081 }
 0x2ac   : > { %3574 = vmatprep.mubr.f32.mxu0 %v7047_v40  ;;  %3663 = vmatprep.mubr.f32.mxu1 %v7047_v40 }
 0x2af   : > { %4817 = vmatmul.mubr.msk.f32.gmra.mxu0 %vm3092_vm2, %v6738_v44  ;;  %4823 = vmatmul.mubr.msk.f32.gmra.mxu1 %vm3092_vm2, %v6738_v44  ;;  %v6895_v41 = vpop.permute.xlu1 %3077 }
 0x2b0   : > { %3580 = vmatprep.mubr.f32.mxu0 %v7047_v40  ;;  %3669 = vmatprep.mubr.f32.mxu1 %v7047_v40 }
 0x2b3   : > { %4818 = vmatmul.mubr.msk.f32.gmra.mxu0 %vm3092_vm2, %v6749_v19  ;;  %4824 = vmatmul.mubr.msk.f32.gmra.mxu1 %vm3092_vm2, %v6749_v19 }
 0x2b4   : > { %3834 = vmatprep.mubr.f32.mxu0 %v7047_v40  ;;  %3905 = vmatprep.mubr.f32.mxu1 %v7047_v40 }
 0x2e7   : > { %v3208_v43 = vpop.f32.mrf.mxu0  ;;  %v3297_v49 = vpop.f32.mrf.mxu1 }
 0x2e8   : > { %v3209_v14 = vadd.f32 %v3208_v43, %v6895_v41  ;;  %v3298_v3 = vadd.f32 %v3297_v49, %v6895_v41 }
 0x2e9   : > { %v3210_v33 = vpop.f32.mrf.mxu0  ;;  %v3299_v44 = vpop.f32.mrf.mxu1 }
 0x2ea   : > { %v3211_v62 = vadd.f32 %v3210_v33, %v6895_v41  ;;  %v3300_v47 = vadd.f32 %v3299_v44, %v6895_v41  ;;  %v3676_v12 = vmax.f32 %v3209_v14, 0.0  ;;  %v3678_v38 = vmax.f32 %v3298_v3, 0.0 }
 0x2eb   : > { %v3214_v53 = vpop.f32.mrf.mxu0  ;;  %v3303_v0 = vpop.f32.mrf.mxu1 }
 0x2ec   : > { %v3215_v1 = vadd.f32 %v3214_v53, %v6891_v51  ;;  %v3304_v61 = vadd.f32 %v3303_v0, %v6891_v51  ;;  %v3677_v18 = vmax.f32 %v3211_v62, 0.0  ;;  %v3679_v31 = vmax.f32 %v3300_v47, 0.0 }
 0x2ed   : > { %v3216_v52 = vpop.f32.mrf.mxu0  ;;  %v3305_v58 = vpop.f32.mrf.mxu1 }
 0x2ee   : > { %v3217_v46 = vadd.f32 %v3216_v52, %v6891_v51  ;;  %v3306_v22 = vadd.f32 %v3305_v58, %v6891_v51  ;;  %v3688_v54 = vmax.f32 %v3215_v1, 0.0  ;;  %v3690_v4 = vmax.f32 %v3304_v61, 0.0 }
 0x2ef   : > { %v3220_v59 = vpop.f32.mrf.mxu0  ;;  %v3309_v29 = vpop.f32.mrf.mxu1 }
 0x2f0   : > { %v3221_v15 = vadd.f32 %v3220_v59, %v6893_v50  ;;  %v3310_v13 = vadd.f32 %v3309_v29, %v6893_v50  ;;  %v3689_v63 = vmax.f32 %v3217_v46, 0.0  ;;  %v3691_v24 = vmax.f32 %v3306_v22, 0.0 }
 0x2f1   : > { %v3222_v19 = vpop.f32.mrf.mxu0  ;;  %v3311_v37 = vpop.f32.mrf.mxu1 }
 0x2f2   : > { %v3223_v9 = vadd.f32 %v3222_v19, %v6893_v50  ;;  %v3312_v20 = vadd.f32 %v3311_v37, %v6893_v50  ;;  %v3700_v30 = vmax.f32 %v3221_v15, 0.0  ;;  %v3702_v11 = vmax.f32 %v3310_v13, 0.0 }
 0x2f3   : > { %v3226_v42 = vpop.f32.mrf.mxu0  ;;  %v3315_v21 = vpop.f32.mrf.mxu1 }
 0x2f4   : > { %v3227_v8 = vadd.f32 %v3226_v42, %v6889_v39  ;;  %v3316_v34 = vadd.f32 %v3315_v21, %v6889_v39  ;;  %v3701_v7 = vmax.f32 %v3223_v9, 0.0  ;;  %v3703_v26 = vmax.f32 %v3312_v20, 0.0 }
 0x2f5   : > { %v3228_v10 = vpop.f32.mrf.mxu0  ;;  %v3317_v28 = vpop.f32.mrf.mxu1 }
 0x2f6   : > { %v3229_v48 = vadd.f32 %v3228_v10, %v6889_v39  ;;  %v3318_v45 = vadd.f32 %v3317_v28, %v6889_v39  ;;  %v3712_v23 = vmax.f32 %v3227_v8, 0.0  ;;  %v3714_v2 = vmax.f32 %v3316_v34, 0.0 }
 0x2f8   : > { %v3713_v6 = vmax.f32 %v3229_v48, 0.0  ;;  %v3715_v60 = vmax.f32 %v3318_v45, 0.0 }
 0x2fa   : > { %4825 = vmatprep.subr.msk.mxu0 %vm3105_vm1, %v3713_v6  ;;  %4828 = vmatprep.subr.msk.mxu1 %vm3105_vm1, %v3715_v60 }
 0x2fb   : > { %4826 = vmatpush1.msk.msra.mxu0 %vm3105_vm1, %v3712_v23  ;;  %4829 = vmatpush1.msk.msra.mxu1 %vm3105_vm1, %v3714_v2 }
 0x2fc   : > { %3796 = vmatprep.subr.mxu0 %v3701_v7  ;;  %3867 = vmatprep.subr.mxu1 %v3703_v26 }
 0x2fd   : > { %3797 = vmatpush1.msra.mxu0 %v3700_v30  ;;  %3868 = vmatpush1.msra.mxu1 %v3702_v11 }
 0x2fe   : > { %3798 = vmatprep.subr.mxu0 %v3689_v63  ;;  %3869 = vmatprep.subr.mxu1 %v3691_v24 }
 0x2ff   : > { %3799 = vmatpush1.msra.mxu0 %v3688_v54  ;;  %3870 = vmatpush1.msra.mxu1 %v3690_v4 }
 0x300   : > { %3800 = vmatprep.subr.mxu0 %v3677_v18  ;;  %3871 = vmatprep.subr.mxu1 %v3679_v31 }
 0x301   : > { %3801 = vmatpush1.msra.mxu0 %v3676_v12  ;;  %3872 = vmatpush1.msra.mxu1 %v3678_v38 }
 0x302   : > { %4827 = vmatmul.mubr.msk.f32.vlgmr.msra.gmra.mxu0 %vm3092_vm2, %v6920_v32  ;;  %4830 = vmatmul.mubr.msk.f32.vlgmr.msra.gmra.mxu1 %vm3092_vm2, %v6920_v32 }
 0x303   : > { %3976 = vmatprep.mubr.f32.mxu0 %v7047_v40  ;;  %4047 = vmatprep.mubr.f32.mxu1 %v7047_v40 }
 0x327   : > { %v3386_v25 = vpop.f32.mrf.mxu0  ;;  %v3475_v35 = vpop.f32.mrf.mxu1 }
 0x328   : > { %v3387_v1 = vadd.f32 %v3386_v25, %v6895_v41  ;;  %v3476_v61 = vadd.f32 %v3475_v35, %v6895_v41 }
 0x329   : > { %v3388_v55 = vpop.f32.mrf.mxu0  ;;  %v3477_v56 = vpop.f32.mrf.mxu1 }
 0x32a   : > { %v3389_v8 = vadd.f32 %v3388_v55, %v6895_v41  ;;  %v3478_v34 = vadd.f32 %v3477_v56, %v6895_v41  ;;  %v3680_v14 = vmax.f32 %v3387_v1, 0.0  ;;  %v3682_v3 = vmax.f32 %v3476_v61, 0.0 }
 0x32b   : > { %v3392_v57 = vpop.f32.mrf.mxu0  ;;  %v3481_v36 = vpop.f32.mrf.mxu1 }
 0x32c   : > { %v3393_v15 = vadd.f32 %v3392_v57, %v6891_v51  ;;  %v3482_v13 = vadd.f32 %v3481_v36, %v6891_v51  ;;  %v3681_v30 = vmax.f32 %v3389_v8, 0.0  ;;  %v3683_v11 = vmax.f32 %v3478_v34, 0.0 }
 0x32d   : > { %v3394_v27 = vpop.f32.mrf.mxu0  ;;  %v3483_v5 = vpop.f32.mrf.mxu1 }
 0x32e   : > { %v3395_v9 = vadd.f32 %v3394_v27, %v6891_v51  ;;  %v3484_v20 = vadd.f32 %v3483_v5, %v6891_v51  ;;  %v3692_v7 = vmax.f32 %v3393_v15, 0.0  ;;  %v3694_v26 = vmax.f32 %v3482_v13, 0.0 }
 0x32f   : > { %v3398_v43 = vpop.f32.mrf.mxu0  ;;  %v3487_v49 = vpop.f32.mrf.mxu1 }
 0x330   : > { %v3399_v19 = vadd.f32 %v3398_v43, %v6893_v50  ;;  %v3488_v37 = vadd.f32 %v3487_v49, %v6893_v50  ;;  %v3693_v6 = vmax.f32 %v3395_v9, 0.0  ;;  %v3695_v60 = vmax.f32 %v3484_v20, 0.0 }
 0x331   : > { %v3400_v33 = vpop.f32.mrf.mxu0  ;;  %v3489_v44 = vpop.f32.mrf.mxu1 }
 0x332   : > { %v3401_v52 = vadd.f32 %v3400_v33, %v6893_v50  ;;  %v3490_v58 = vadd.f32 %v3489_v44, %v6893_v50  ;;  %v3704_v23 = vmax.f32 %v3399_v19, 0.0  ;;  %v3706_v2 = vmax.f32 %v3488_v37, 0.0 }
 0x333   : > { %v3404_v53 = vpop.f32.mrf.mxu0  ;;  %v3493_v0 = vpop.f32.mrf.mxu1 }
 0x334   : > { %v3405_v59 = vadd.f32 %v3404_v53, %v6889_v39  ;;  %v3494_v29 = vadd.f32 %v3493_v0, %v6889_v39  ;;  %v3705_v48 = vmax.f32 %v3401_v52, 0.0  ;;  %v3707_v45 = vmax.f32 %v3490_v58, 0.0 }
 0x335   : > { %v3406_v42 = vpop.f32.mrf.mxu0  ;;  %v3495_v21 = vpop.f32.mrf.mxu1 }
 0x336   : > { %v3407_v10 = vadd.f32 %v3406_v42, %v6889_v39  ;;  %v3496_v28 = vadd.f32 %v3495_v21, %v6889_v39  ;;  %v3716_v62 = vmax.f32 %v3405_v59, 0.0  ;;  %v3718_v47 = vmax.f32 %v3494_v29, 0.0 }
 0x338   : > { %v3717_v46 = vmax.f32 %v3407_v10, 0.0  ;;  %v3719_v22 = vmax.f32 %v3496_v28, 0.0 }
 0x33a   : > { %4831 = vmatprep.subr.msk.mxu0 %vm3105_vm1, %v3717_v46  ;;  %4834 = vmatprep.subr.msk.mxu1 %vm3105_vm1, %v3719_v22  ;;  %v4213_v22 = vlaneseq }
 0x33b   : > { %4832 = vmatpush1.msk.msra.mxu0 %vm3105_vm1, %v3716_v62  ;;  %4835 = vmatpush1.msk.msra.mxu1 %vm3105_vm1, %v3718_v47 }
 0x33c   : > { %3938 = vmatprep.subr.mxu0 %v3705_v48  ;;  %4009 = vmatprep.subr.mxu1 %v3707_v45  ;;  %v5453_v45 = vmov 1983009808   ;;  %v4214_v1 = vshrl.u32 %v4213_v22, 7 }
 0x33d   : > { %3939 = vmatpush1.msra.mxu0 %v3704_v23  ;;  %4010 = vmatpush1.msra.mxu1 %v3706_v2  ;;  %v4211_v46 = vunpack.c.l.s4 %v5453_v45  ;;  %v3729_v23 = vpop.permute.xlu0 %3728 }
 0x33e   : > { %3940 = vmatprep.subr.mxu0 %v3693_v6  ;;  %4011 = vmatprep.subr.mxu1 %v3695_v60 }
 0x33f   : > { %3941 = vmatpush1.msra.mxu0 %v3692_v7  ;;  %4012 = vmatpush1.msra.mxu1 %v3694_v26  ;;  %v4212_v2 = vunpack.c.0.s8 %v4211_v46 }
 0x340   : > { %3942 = vmatprep.subr.mxu0 %v3681_v30  ;;  %4013 = vmatprep.subr.mxu1 %v3683_v11 }
 0x341   : > { %3943 = vmatpush1.msra.mxu0 %v3680_v14  ;;  %4014 = vmatpush1.msra.mxu1 %v3682_v3  ;;  %v4215_v14 = vsub.s32 %v4212_v2, %v4214_v1 }
 0x342   : > { %4833 = vmatmul.mubr.msk.f32.vlgmr.msra.gmra.mxu0 %vm3092_vm2, %v6920_v32  ;;  %4836 = vmatmul.mubr.msk.f32.vlgmr.msra.gmra.mxu1 %vm3092_vm2, %v6920_v32 }
 0x343   : > { %4118 = vmatprep.mubr.f32.mxu0 %v7047_v40  ;;  %4189 = vmatprep.mubr.f32.mxu1 %v7047_v40 }
 0x367   : > { %v3564_v63 = vpop.f32.mrf.mxu0  ;;  %v3653_v24 = vpop.f32.mrf.mxu1 }
 0x368   : > { %v3654_v9 = vadd.f32 %v3653_v24, %v6895_v41 }
 0x369   : > { %v3566_v54 = vpop.f32.mrf.mxu0  ;;  %v3655_v4 = vpop.f32.mrf.mxu1 }
 0x36a   : > { %v3567_v21 = vadd.f32 %v3566_v54, %v6895_v41 }
 0x36b   : > { %v3570_v18 = vpop.f32.mrf.mxu0  ;;  %v3659_v31 = vpop.f32.mrf.mxu1 }
 0x36c   : > { %v3571_v29 = vadd.f32 %v3570_v18, %v6891_v51  ;;  %v3660_v19 = vadd.f32 %v3659_v31, %v6891_v51  ;;  %v3685_v62 = vmax.f32 %v3567_v21, 0.0 }
 0x36d   : > { %v3572_v12 = vpop.f32.mrf.mxu0  ;;  %v3661_v38 = vpop.f32.mrf.mxu1 }
 0x36e   : > { %v3573_v0 = vadd.f32 %v3572_v12, %v6891_v51  ;;  %v3662_v52 = vadd.f32 %v3661_v38, %v6891_v51  ;;  %v3696_v15 = vmax.f32 %v3571_v29, 0.0  ;;  %v3698_v13 = vmax.f32 %v3660_v19, 0.0 }
 0x36f   : > { %v3576_v17 = vpop.f32.mrf.mxu0  ;;  %v3665_v16 = vpop.f32.mrf.mxu1 }
 0x370   : > { %v3577_v44 = vadd.f32 %v3576_v17, %v6893_v50  ;;  %v3666_v53 = vadd.f32 %v3665_v16, %v6893_v50  ;;  %v3697_v51 = vmax.f32 %v3573_v0, 0.0  ;;  %v3699_v28 = vmax.f32 %v3662_v52, 0.0 }
 0x371   : > { %v3578_v25 = vpop.f32.mrf.mxu0  ;;  %v3667_v35 = vpop.f32.mrf.mxu1 }
 0x372   : > { %v3579_v5 = vadd.f32 %v3578_v25, %v6893_v50  ;;  %v3668_v43 = vadd.f32 %v3667_v35, %v6893_v50  ;;  %v3565_v50 = vadd.f32 %v3564_v63, %v6895_v41  ;;  %v3708_v20 = vmax.f32 %v3577_v44, 0.0 }
 0x373   : > { %v3582_v55 = vpop.f32.mrf.mxu0  ;;  %v3671_v56 = vpop.f32.mrf.mxu1  ;;  %v3710_v10 = vmax.f32 %v3666_v53, 0.0 }
 0x374   : > { %v3583_v57 = vadd.f32 %v3582_v55, %v6889_v39  ;;  %v3672_v36 = vadd.f32 %v3671_v56, %v6889_v39  ;;  %v3709_v8 = vmax.f32 %v3579_v5, 0.0  ;;  %v3711_v34 = vmax.f32 %v3668_v43, 0.0 }
 0x375   : > { %v3584_v27 = vpop.f32.mrf.mxu0  ;;  %v3673_v40 = vpop.f32.mrf.mxu1  ;;  %v3684_v48 = vmax.f32 %v3565_v50, 0.0 }
 0x376   : > { %v3585_v49 = vadd.f32 %v3584_v27, %v6889_v39  ;;  %v3674_v33 = vadd.f32 %v3673_v40, %v6889_v39  ;;  %v3720_v37 = vmax.f32 %v3583_v57, 0.0  ;;  %v3722_v42 = vmax.f32 %v3672_v36, 0.0 }
 0x377   : > { %v3656_v39 = vadd.f32 %v3655_v4, %v6895_v41  ;;  %v3686_v41 = vmax.f32 %v3654_v9, 0.0 }
 0x378   : > { %v3721_v58 = vmax.f32 %v3585_v49, 0.0  ;;  %v3723_v59 = vmax.f32 %v3674_v33, 0.0 }
 0x379   : > { %v3687_v47 = vmax.f32 %v3656_v39, 0.0 }
 0x37a   : > { %4837 = vmatprep.subr.msk.mxu0 %vm3105_vm1, %v3721_v58  ;;  %4840 = vmatprep.subr.msk.mxu1 %vm3105_vm1, %v3723_v59 }
 0x37b   : > { %4838 = vmatpush1.msk.msra.mxu0 %vm3105_vm1, %v3720_v37  ;;  %4841 = vmatpush1.msk.msra.mxu1 %vm3105_vm1, %v3722_v42 }
 0x37c   : > { %4080 = vmatprep.subr.mxu0 %v3709_v8  ;;  %4151 = vmatprep.subr.mxu1 %v3711_v34 }
 0x37d   : > { %4081 = vmatpush1.msra.mxu0 %v3708_v20  ;;  %4152 = vmatpush1.msra.mxu1 %v3710_v10 }
 0x37e   : > { %4082 = vmatprep.subr.mxu0 %v3697_v51  ;;  %4153 = vmatprep.subr.mxu1 %v3699_v28 }
 0x37f   : > { %4083 = vmatpush1.msra.mxu0 %v3696_v15  ;;  %4154 = vmatpush1.msra.mxu1 %v3698_v13 }
 0x380   : > { %4084 = vmatprep.subr.mxu0 %v3685_v62  ;;  %4155 = vmatprep.subr.mxu1 %v3687_v47 }
 0x381   : > { %4085 = vmatpush1.msra.mxu0 %v3684_v48  ;;  %4156 = vmatpush1.msra.mxu1 %v3686_v41 }
 0x382   : > { %4839 = vmatmul.mubr.msk.f32.vlgmr.msra.gmra.mxu0 %vm3092_vm2, %v6920_v32  ;;  %4842 = vmatmul.mubr.msk.f32.vlgmr.msra.gmra.mxu1 %vm3092_vm2, %v6920_v32 }
 0x3c2   : > { %v3836_v61 = vpop.f32.mrf.mxu0  ;;  %v3907_v6 = vpop.f32.mrf.mxu1 }
 0x3c3   : > { %v3837_v60 = vadd.f32 %v3836_v61, %v3729_v23  ;;  %v3908_v7 = vadd.f32 %v3907_v6, %v3729_v23 }
 0x3c4   : > { %v3838_v26 = vpop.f32.mrf.mxu0  ;;  %v3909_v30 = vpop.f32.mrf.mxu1 }
 0x3c5   : > { %v3839_v11 = vadd.f32 %v3838_v26, %v3729_v23  ;;  %v3910_v3 = vadd.f32 %v3909_v30, %v3729_v23 }
 0x3c7   : > { %v4208_v32 = vcombine.low %v3837_v60, %v3839_v11  ;;  %v4209_v63 = vcombine.low %v3908_v7, %v3910_v3 }
 0x3c9   : > { %v4216_v24 = vrot.slane %v4208_v32, %v4215_v14  ;;  %v4223_v54 = vrot.slane %v4209_v63, %v4215_v14 }
 0x3cb   : > { %v4224_v4 = vcombine.low %v4216_v24, %v4223_v54 }
 0x3cd   : > { %4262 = vst [vmem:[%s6984_s19] sm:$0xff] %v4224_v4 }
 0x402   : > { %v3978_v18 = vpop.f32.mrf.mxu0  ;;  %v4049_v31 = vpop.f32.mrf.mxu1 }
 0x403   : > { %v3979_v12 = vadd.f32 %v3978_v18, %v3729_v23  ;;  %v4050_v38 = vadd.f32 %v4049_v31, %v3729_v23 }
 0x404   : > { %v3980_v17 = vpop.f32.mrf.mxu0  ;;  %v4051_v16 = vpop.f32.mrf.mxu1 }
 0x405   : > { %v3981_v25 = vadd.f32 %v3980_v17, %v3729_v23  ;;  %v4052_v35 = vadd.f32 %v4051_v16, %v3729_v23 }
 0x407   : > { %v4225_v55 = vcombine.low %v3979_v12, %v3981_v25  ;;  %v4226_v56 = vcombine.low %v4050_v38, %v4052_v35 }
 0x409   : > { %v4233_v57 = vrot.slane %v4225_v55, %v4215_v14  ;;  %v4240_v36 = vrot.slane %v4226_v56, %v4215_v14 }
 0x40b   : > { %v4241_v27 = vcombine.low %v4233_v57, %v4240_v36 }
 0x40d   : > { %4263 = vst [vmem:[%s6984_s19 + $0x8] sm:$0xff] %v4241_v27 }
 0x442   : > { %v4120_v40 = vpop.f32.mrf.mxu0  ;;  %v4191_v5 = vpop.f32.mrf.mxu1 }
 0x443   : > { %v4121_v33 = vadd.f32 %v4120_v40, %v3729_v23  ;;  %v4192_v44 = vadd.f32 %v4191_v5, %v3729_v23 }
 0x444   : > { %v4122_v43 = vpop.f32.mrf.mxu0  ;;  %v4193_v49 = vpop.f32.mrf.mxu1 }
 0x445   : > { %v4123_v53 = vadd.f32 %v4122_v43, %v3729_v23  ;;  %v4194_v0 = vadd.f32 %v4193_v49, %v3729_v23 }
 0x447   : > { %v4242_v52 = vcombine.low %v4121_v33, %v4123_v53  ;;  %v4243_v58 = vcombine.low %v4192_v44, %v4194_v0 }
 0x449   : > { %v4250_v59 = vrot.slane %v4242_v52, %v4215_v14  ;;  %v4257_v29 = vrot.slane %v4243_v58, %v4215_v14 }
 0x44b   : > { %v4258_v19 = vcombine.low %v4250_v59, %v4257_v29 }
 0x44d   : > { %4264 = vst [vmem:[%s6984_s19 + $0x10] sm:$0xff] %v4258_v19 }
 0x44e   : > { %5399 = shalt.err (!%p5396_p3)
}
 0x44f   : > { %s5400_s14 = scalar_lea.hbm %s4278_s9, 384  ;;  %s5404_s17 = scalar_lea.hbm %s7031_s6, 768 }
 0x450   : > { %p5401_p4 = scmp.ne.s32.totalorder %s4278_s9, %s5400_s14  ;;  %p5405_p9 = scmp.lt.s32.totalorder %s4278_s9, %s7031_s6 }
 0x451   : > { %p5406_p10 = scmp.lt.s32.totalorder %s5404_s17, %s5400_s14 }
 0x452   : > { %p5402_p7 = pnand %p5401_p4, %p5528_p5 }
 0x453   : > { %p5407_p11 = por %p5406_p10, %p5405_p9 }
 0x454   : > { %p5403_p8 = pneg %p5402_p7 }
 0x456   : > { %p5408_p12 = pnand %p5407_p11, %p5403_p8 }
 0x458   : > { %5411 = shalt.err (!%p5408_p12)
}
 0x459   : > { %5328 = dma.vmem_to_hbm [thread:$0]  (%p5528_p5), %s4281_s26, 384, %s4278_s9, %s4266_s11  }
 0x45a PF: > { %p5334_p13 = scmp.ge.s32.totalorder %s5446_s24, 2  ;;  %s4292_s20 = sand.u32 1, %s5434_s21  }
 0x45b   : > { %s4293_s28 = scalar_lea.sflag [#allocation3], %s4292_s20 }
 0x45c   : > { %p5331_p0 = pnand %p5334_p13, %p5532_p6 }
 0x45e   : > { %p5332_p1 = pneg %p5331_p0 }
 0x460   : > { %5429 = dma.done.wait (%p5332_p1), %s4293_s28, 384  }
 0x461   : > { %5431 = vsyncadd (%p5332_p1), %s4293_s28, 4294966912  ;;  %p16_p2 = scmp.ge.s32.totalorder %s5515_s27, 4   ;;  %s7059_s21 = smov %s5438_s22 }
 0x462   : > { %s7060_s22 = smov %s5442_s23  ;;  %s7061_s23 = smov %s5526_s30 }
 0x463   : > { %s7062_s24 = smov %s5515_s27  ;;  %18 = sbr.rel (!%p16_p2) target bundleno = 3 (0x3), region = 82 }
 0x468   :  { %4298 = vsyncpa [#allocation3], 1 }
 0x469   :  { %4300 = vsyncpa [#allocation3 + $0x1], 1 }

</bundles_post_ra>
